<compile_context>
chip_gen: v5e
topology: v5e:2x2
jax: 0.10.0
libtpu: 0.0.40
codegen_flags: <defaults>
</compile_context>

<pallas_src>
import functools

import jax
import jax.numpy as jnp
from jax.experimental import pallas as pl
from jax.experimental.pallas import tpu as pltpu

IN_FEATURES = 28 * 28          # 784
H1, H2, OUT = 120, 84, 10      # logical sizes (nn.Linear)
H1P, H2P, OUTP = 128, 128, 128  # lane-padded sizes used inside the kernel
DEFAULT_TB = 256               # batch tile (multiple of 8; fills 256-row MXU)


def garment_mlp_kernel(x_ref, w1_ref, b1_ref, w2_ref, b2_ref, w3_ref, b3_ref,
                       o_ref):
    # fc1 + relu : (TB, 784) bf16 @ (784, 128) bf16 -> f32 accumulate
    h1 = jnp.dot(x_ref[...], w1_ref[...], preferred_element_type=jnp.float32)
    h1 = jnp.maximum(h1 + b1_ref[...], 0.0)
    # fc2 + relu : re-cast activation to bf16 for the MXU, accumulate in f32
    h2 = jnp.dot(h1.astype(jnp.bfloat16), w2_ref[...],
                 preferred_element_type=jnp.float32)
    h2 = jnp.maximum(h2 + b2_ref[...], 0.0)
    # fc3 (logits, no activation); padded lanes 10..127 carry zeros
    out = jnp.dot(h2.astype(jnp.bfloat16), w3_ref[...],
                  preferred_element_type=jnp.float32)
    o_ref[...] = (out + b3_ref[...]).astype(o_ref.dtype)


@functools.partial(jax.jit, static_argnames=("tb",))
def garment_classifier_forward(x, kernel_params, *, tb=DEFAULT_TB):
    """x: (B, 1, 28, 28) or (B, 784) float32. Returns (B, 10) f32 logits."""
    w1, b1, w2, b2, w3, b3 = kernel_params
    x2d = x.reshape(-1, IN_FEATURES).astype(jnp.bfloat16)  # torch x.view(-1, 784)
    B = x2d.shape[0]

    # Pad batch to a multiple of the tile so every grid step is full.
    n_tiles = pl.cdiv(B, tb)
    Bp = n_tiles * tb
    if Bp != B:
        x2d = jnp.pad(x2d, ((0, Bp - B), (0, 0)))

    bytes_accessed = (Bp * IN_FEATURES * 2                       # x (bf16)
                      + (IN_FEATURES * H1P + H1P * H2P + H2P * OUTP) * 2  # W (bf16)
                      + (H1P + H2P + OUTP) * 4                   # biases (f32)
                      + Bp * OUTP * 4)                           # logits out (f32)
    cost = pl.CostEstimate(
        flops=2 * Bp * (IN_FEATURES * H1 + H1 * H2 + H2 * OUT),
        transcendentals=0,
        bytes_accessed=bytes_accessed,
    )

    out = pl.pallas_call(
        garment_mlp_kernel,
        out_shape=jax.ShapeDtypeStruct((Bp, OUTP), jnp.float32),
        grid_spec=pltpu.PrefetchScalarGridSpec(
            num_scalar_prefetch=0,
            grid=(n_tiles,),
            in_specs=[
                pl.BlockSpec((tb, IN_FEATURES), lambda i: (i, 0)),   # x tile
                pl.BlockSpec((IN_FEATURES, H1P), lambda i: (0, 0)),  # W1 resident
                pl.BlockSpec((1, H1P), lambda i: (0, 0)),            # b1
                pl.BlockSpec((H1P, H2P), lambda i: (0, 0)),          # W2
                pl.BlockSpec((1, H2P), lambda i: (0, 0)),            # b2
                pl.BlockSpec((H2P, OUTP), lambda i: (0, 0)),         # W3
                pl.BlockSpec((1, OUTP), lambda i: (0, 0)),           # b3
            ],
            out_specs=pl.BlockSpec((tb, OUTP), lambda i: (i, 0)),    # lane-dense
        ),
        compiler_params=pltpu.CompilerParams(
            dimension_semantics=("parallel",)),
        cost_estimate=cost,
    )(x2d, w1, b1, w2, b2, w3, b3)

    return out[:B, :OUT]


def init_params(key):
    """nn.Linear-style init; weights stored transposed as (in, out), f32."""
    k1, k2, k3, k4, k5, k6 = jax.random.split(key, 6)

    def uniform(k, shape, fan_in):
        bound = 1.0 / jnp.sqrt(fan_in)
        return jax.random.uniform(k, shape, jnp.float32, -bound, bound)

    w1 = uniform(k1, (IN_FEATURES, H1), 784.0)
    b1 = uniform(k2, (1, H1), 784.0)
    w2 = uniform(k3, (H1, H2), 120.0)
    b2 = uniform(k4, (1, H2), 120.0)
    w3 = uniform(k5, (H2, OUT), 84.0)
    b3 = uniform(k6, (1, OUT), 84.0)
    return (w1, b1, w2, b2, w3, b3)


def prepare_kernel_params(params):
    """Zero-pad feature dims to 128 lanes; weights bf16, biases f32."""
    w1, b1, w2, b2, w3, b3 = params

    def pad_w(w, kp, np_):
        k, n = w.shape
        return jnp.pad(w, ((0, kp - k), (0, np_ - n))).astype(jnp.bfloat16)

    def pad_b(b, np_):
        return jnp.pad(b, ((0, 0), (0, np_ - b.shape[1]))).astype(jnp.float32)

    return (pad_w(w1, IN_FEATURES, H1P), pad_b(b1, H1P),
            pad_w(w2, H1P, H2P), pad_b(b2, H2P),
            pad_w(w3, H2P, OUTP), pad_b(b3, OUTP))


def reference_forward_bf16(x, kernel_params):
    """Reference with the same bf16 weight/activation quantization as the kernel."""
    w1, b1, w2, b2, w3, b3 = kernel_params
    x2d = x.reshape(-1, IN_FEATURES).astype(jnp.bfloat16)
    h1 = jnp.maximum(
        jnp.dot(x2d, w1, preferred_element_type=jnp.float32) + b1, 0.0)
    h2 = jnp.maximum(
        jnp.dot(h1.astype(jnp.bfloat16), w2,
                preferred_element_type=jnp.float32) + b2, 0.0)
    out = jnp.dot(h2.astype(jnp.bfloat16), w3,
                  preferred_element_type=jnp.float32) + b3
    return out[:, :OUT]


def reference_forward_f32(x, params):
    """Pure-f32 reference matching the PyTorch module exactly."""
    w1, b1, w2, b2, w3, b3 = params
    x2d = x.reshape(-1, IN_FEATURES)
    h1 = jnp.maximum(x2d @ w1 + b1, 0.0)
    h2 = jnp.maximum(h1 @ w2 + b2, 0.0)
    return h2 @ w3 + b3


if __name__ == "__main__":
    key = jax.random.PRNGKey(0)
    kx, kp = jax.random.split(key)

    B = 8
    x = jax.random.normal(kx, (B, 1, 28, 28), dtype=jnp.float32)  # NCHW
    params = init_params(kp)
    kparams = prepare_kernel_params(params)

    out = garment_classifier_forward(x, kparams)
    out = jax.block_until_ready(out)
    assert out.shape == (B, OUT), out.shape

    # Tight check vs a reference that applies identical bf16 quantization.
    ref_bf16 = reference_forward_bf16(x, kparams)
    assert jnp.allclose(out, ref_bf16, atol=1e-3, rtol=1e-3), \
        "mismatch vs bf16 reference"

    # Loose check vs the pure-f32 PyTorch-equivalent forward (bf16 rounding only).
    ref_f32 = reference_forward_f32(x, params)
    assert jnp.allclose(out, ref_f32, atol=5e-2, rtol=5e-2), \
        "mismatch vs f32 reference"

    print("KERNEL_OK")
</pallas_src>

<mosaic_0001>
module attributes {stable_mosaic.version = 11 : i64} {
  func.func @garment_mlp_kernel(%arg0: i32, %arg1: memref<256x784xbf16, #tpu.memory_space<vmem>>, %arg2: memref<784x128xbf16, #tpu.memory_space<vmem>>, %arg3: memref<1x128xf32, #tpu.memory_space<vmem>>, %arg4: memref<128x128xbf16, #tpu.memory_space<vmem>>, %arg5: memref<1x128xf32, #tpu.memory_space<vmem>>, %arg6: memref<128x128xbf16, #tpu.memory_space<vmem>>, %arg7: memref<1x128xf32, #tpu.memory_space<vmem>>, %arg8: memref<256x128xf32, #tpu.memory_space<vmem>>) attributes {dimension_semantics = [#tpu.dimension_semantics<parallel>], iteration_bounds = array<i64: 1>, scalar_prefetch = 0 : i64, scratch_operands = 0 : i64, tpu.core_type = #tpu.core_type<tc>, window_params = [{transform_indices = @transform_0, window_bounds = array<i64: 256, 784>}, {pipeline_mode = #tpu.pipeline_mode<synchronous>, transform_indices = @transform_1, window_bounds = array<i64: 784, 128>}, {pipeline_mode = #tpu.pipeline_mode<synchronous>, transform_indices = @transform_2, window_bounds = array<i64: 1, 128>}, {pipeline_mode = #tpu.pipeline_mode<synchronous>, transform_indices = @transform_3, window_bounds = array<i64: 128, 128>}, {pipeline_mode = #tpu.pipeline_mode<synchronous>, transform_indices = @transform_4, window_bounds = array<i64: 1, 128>}, {pipeline_mode = #tpu.pipeline_mode<synchronous>, transform_indices = @transform_5, window_bounds = array<i64: 128, 128>}, {pipeline_mode = #tpu.pipeline_mode<synchronous>, transform_indices = @transform_6, window_bounds = array<i64: 1, 128>}, {transform_indices = @transform_7, window_bounds = array<i64: 256, 128>}]} {
    %c0 = arith.constant 0 : index
    %c0_0 = arith.constant 0 : index
    %0 = vector.load %arg1[%c0, %c0_0] : memref<256x784xbf16, #tpu.memory_space<vmem>>, vector<256x784xbf16>
    %c0_1 = arith.constant 0 : index
    %c0_2 = arith.constant 0 : index
    %1 = vector.load %arg2[%c0_1, %c0_2] : memref<784x128xbf16, #tpu.memory_space<vmem>>, vector<784x128xbf16>
    %cst = arith.constant dense<0.000000e+00> : vector<256x128xf32>
    %2 = tpu.matmul %0, %1, %cst {dimension_numbers = #tpu.dot_dimension_numbers<[1], [0], [0], [1], [0, 0, 1, 1], [], []>} : vector<256x784xbf16>, vector<784x128xbf16>, vector<256x128xf32> -> vector<256x128xf32>
    %c0_3 = arith.constant 0 : index
    %c0_4 = arith.constant 0 : index
    %3 = vector.load %arg3[%c0_3, %c0_4] : memref<1x128xf32, #tpu.memory_space<vmem>>, vector<1x128xf32>
    %4 = vector.broadcast %3 : vector<1x128xf32> to vector<256x128xf32>
    %5 = arith.addf %2, %4 : vector<256x128xf32>
    %cst_5 = arith.constant 0.000000e+00 : f32
    %6 = vector.broadcast %cst_5 : f32 to vector<256x128xf32>
    %7 = arith.maximumf %5, %6 : vector<256x128xf32>
    %8 = arith.truncf %7 : vector<256x128xf32> to vector<256x128xbf16>
    %c0_6 = arith.constant 0 : index
    %c0_7 = arith.constant 0 : index
    %9 = vector.load %arg4[%c0_6, %c0_7] : memref<128x128xbf16, #tpu.memory_space<vmem>>, vector<128x128xbf16>
    %cst_8 = arith.constant dense<0.000000e+00> : vector<256x128xf32>
    %10 = tpu.matmul %8, %9, %cst_8 {dimension_numbers = #tpu.dot_dimension_numbers<[1], [0], [0], [1], [0, 0, 1, 1], [], []>} : vector<256x128xbf16>, vector<128x128xbf16>, vector<256x128xf32> -> vector<256x128xf32>
    %c0_9 = arith.constant 0 : index
    %c0_10 = arith.constant 0 : index
    %11 = vector.load %arg5[%c0_9, %c0_10] : memref<1x128xf32, #tpu.memory_space<vmem>>, vector<1x128xf32>
    %12 = vector.broadcast %11 : vector<1x128xf32> to vector<256x128xf32>
    %13 = arith.addf %10, %12 : vector<256x128xf32>
    %cst_11 = arith.constant 0.000000e+00 : f32
    %14 = vector.broadcast %cst_11 : f32 to vector<256x128xf32>
    %15 = arith.maximumf %13, %14 : vector<256x128xf32>
    %16 = arith.truncf %15 : vector<256x128xf32> to vector<256x128xbf16>
    %c0_12 = arith.constant 0 : index
    %c0_13 = arith.constant 0 : index
    %17 = vector.load %arg6[%c0_12, %c0_13] : memref<128x128xbf16, #tpu.memory_space<vmem>>, vector<128x128xbf16>
    %cst_14 = arith.constant dense<0.000000e+00> : vector<256x128xf32>
    %18 = tpu.matmul %16, %17, %cst_14 {dimension_numbers = #tpu.dot_dimension_numbers<[1], [0], [0], [1], [0, 0, 1, 1], [], []>} : vector<256x128xbf16>, vector<128x128xbf16>, vector<256x128xf32> -> vector<256x128xf32>
    %c0_15 = arith.constant 0 : index
    %c0_16 = arith.constant 0 : index
    %19 = vector.load %arg7[%c0_15, %c0_16] : memref<1x128xf32, #tpu.memory_space<vmem>>, vector<1x128xf32>
    %20 = vector.broadcast %19 : vector<1x128xf32> to vector<256x128xf32>
    %21 = arith.addf %18, %20 : vector<256x128xf32>
    %c0_17 = arith.constant 0 : index
    %c0_18 = arith.constant 0 : index
    %22 = vector.load %arg8[%c0_17, %c0_18] : memref<256x128xf32, #tpu.memory_space<vmem>>, vector<256x128xf32>
    tpu.vector_store %arg8[%c0_17, %c0_18], %21 {strides = array<i32>} : memref<256x128xf32, #tpu.memory_space<vmem>>, vector<256x128xf32>,
    return
  }
  func.func @transform_0(%arg0: i32) -> (i32, i32) {
    %c0_i32 = arith.constant 0 : i32
    %c0_i32_0 = arith.constant 0 : i32
    return %arg0, %c0_i32 : i32, i32
  }
  func.func @transform_1(%arg0: i32) -> (i32, i32) {
    %c0_i32 = arith.constant 0 : i32
    %c0_i32_0 = arith.constant 0 : i32
    %c0_i32_1 = arith.constant 0 : i32
    return %c0_i32, %c0_i32_0 : i32, i32
  }
  func.func @transform_2(%arg0: i32) -> (i32, i32) {
    %c0_i32 = arith.constant 0 : i32
    %c0_i32_0 = arith.constant 0 : i32
    %c0_i32_1 = arith.constant 0 : i32
    return %c0_i32, %c0_i32_0 : i32, i32
  }
  func.func @transform_3(%arg0: i32) -> (i32, i32) {
    %c0_i32 = arith.constant 0 : i32
    %c0_i32_0 = arith.constant 0 : i32
    %c0_i32_1 = arith.constant 0 : i32
    return %c0_i32, %c0_i32_0 : i32, i32
  }
  func.func @transform_4(%arg0: i32) -> (i32, i32) {
    %c0_i32 = arith.constant 0 : i32
    %c0_i32_0 = arith.constant 0 : i32
    %c0_i32_1 = arith.constant 0 : i32
    return %c0_i32, %c0_i32_0 : i32, i32
  }
  func.func @transform_5(%arg0: i32) -> (i32, i32) {
    %c0_i32 = arith.constant 0 : i32
    %c0_i32_0 = arith.constant 0 : i32
    %c0_i32_1 = arith.constant 0 : i32
    return %c0_i32, %c0_i32_0 : i32, i32
  }
  func.func @transform_6(%arg0: i32) -> (i32, i32) {
    %c0_i32 = arith.constant 0 : i32
    %c0_i32_0 = arith.constant 0 : i32
    %c0_i32_1 = arith.constant 0 : i32
    return %c0_i32, %c0_i32_0 : i32, i32
  }
  func.func @transform_7(%arg0: i32) -> (i32, i32) {
    %c0_i32 = arith.constant 0 : i32
    %c0_i32_0 = arith.constant 0 : i32
    return %arg0, %c0_i32 : i32, i32
  }
}

</mosaic_0001>

<bundles_post_ra>
// kernel: garment_classifier_forward.1
= control target key start
LH: loop header
LB: loop body
LE: loop exit
PB: predicated region body
PF: predicated region fallthrough
CT: control target
= control target key end

     0   :  { %vm1111_vm0 = vcmask 130048   ;;  %s4533_s1 = inlined_call_operand.vmem [shape: bf16[784,128], index: 1, kind: input, shape index: {}]   ;;  %s4534_s2 = inlined_call_operand.vmem [shape: f32[1,128], index: 2, kind: input, shape index: {}]   ;;  %s4535_s0 = inlined_call_operand.vmem [shape: bf16[256,784], index: 0, kind: input, shape index: {}]   ;;  %s4536_s3 = inlined_call_operand.vmem [shape: bf16[128,128], index: 3, kind: input, shape index: {}]   ;;  %s4537_s5 = inlined_call_operand.vmem [shape: bf16[128,128], index: 5, kind: input, shape index: {}]   ;;  %s4538_s4 = inlined_call_operand.vmem [shape: f32[1,128], index: 4, kind: input, shape index: {}]   ;;  %s4539_s6 = inlined_call_operand.vmem [shape: f32[1,128], index: 6, kind: input, shape index: {}]   ;;  %s4540_s7 = inlined_call_operand.vmem [shape: f32[256,128], index: 7, kind: output, shape index: {}]  }
   0x1   :  { %v3072_v0 = vld [vmem:[%s4533_s1 + $0x38] sm:$0xff]  ;;  %v3071_v1 = vld [vmem:[%s4533_s1 + $0x30] sm:$0xff]  ;;  %v3070_v2 = vld [vmem:[%s4533_s1 + $0x28] sm:$0xff] }
   0x2   :  { %3130 = vmatpush.bf16.msra.mxu1 %v3072_v0  ;;  %3131 = vmatpush.bf16.msra.mxu2 %v3072_v0  ;;  %v3069_v3 = vld [vmem:[%s4533_s1 + $0x20] sm:$0xff]  ;;  %v3068_v4 = vld [vmem:[%s4533_s1 + $0x18] sm:$0xff]  ;;  %v3067_v5 = vld [vmem:[%s4533_s1 + $0x10] sm:$0xff] }
   0x3   :  { %3132 = vmatpush.bf16.msra.mxu3 %v3072_v0  ;;  %1160 = vmatpush.bf16.msra.mxu0 %v3072_v0  ;;  %v3066_v6 = vld [vmem:[%s4533_s1 + $0x8] sm:$0xff]  ;;  %v3065_v7 = vld [vmem:[%s4533_s1] sm:$0xff]  ;;  %v2984_v9 = vld [vmem:[%s4535_s0 + $0xf8] sm:$0xf0] }
   0x4   :  { %v2343_v8 = vld [vmem:[%s4535_s0 + $0xe0] sm:$0xf]  ;;  %v3012_v11 = vld [vmem:[%s4535_s0 + $0x1d8] sm:$0xf0]  ;;  %v3087_v21 = vld [vmem:[%s4533_s1 + $0xb0] sm:$0xff] }
   0x5   :  { %v2455_v10 = vld [vmem:[%s4535_s0 + $0x1c0] sm:$0xf]  ;;  %v3088_v12 = vld [vmem:[%s4533_s1 + $0xb8] sm:$0xff]  ;;  %v2344_v18 = vor.u32 %v2984_v9, %v2343_v8  ;;  %v3079_v23 = vld [vmem:[%s4533_s1 + $0x70] sm:$0xff] }
   0x6   :  { %3133 = vmatpush.bf16.msra.mxu1 %v3071_v1  ;;  %3134 = vmatpush.bf16.msra.mxu2 %v3071_v1  ;;  %v2567_v13 = vld [vmem:[%s4535_s0 + $0x2a0] sm:$0xf]  ;;  %v3040_v14 = vld [vmem:[%s4535_s0 + $0x2b8] sm:$0xf0]  ;;  %v2456_v19 = vor.u32 %v3012_v11, %v2455_v10  ;;  %v3086_v25 = vld [vmem:[%s4533_s1 + $0xa8] sm:$0xff] }
   0x7   :  { %3135 = vmatpush.bf16.msra.mxu3 %v3071_v1  ;;  %1161 = vmatpush.bf16.msra.mxu0 %v3071_v1  ;;  %v3080_v15 = vld [vmem:[%s4533_s1 + $0x78] sm:$0xff]  ;;  %v2231_v16 = vld [vmem:[%s4535_s0] sm:$0xf]  ;;  %v2568_v20 = vor.u32 %v3040_v14, %v2567_v13  ;;  %v3078_v26 = vld [vmem:[%s4533_s1 + $0x68] sm:$0xff] }
   0x8   :  { %v2956_v17 = vld [vmem:[%s4535_s0 + $0x18] sm:$0xf0]  ;;  %v3095_v27 = vld [vmem:[%s4533_s1 + $0xf0] sm:$0xff]  ;;  %v3085_v30 = vld [vmem:[%s4533_s1 + $0xa0] sm:$0xff] }
   0x9   :  { %v2232_v22 = vor.u32 %v2956_v17, %v2231_v16  ;;  %v3096_v24 = vld [vmem:[%s4533_s1 + $0xf8] sm:$0xff]  ;;  %v3103_v29 = vld [vmem:[%s4533_s1 + $0x130] sm:$0xff]  ;;  %v3077_v31 = vld [vmem:[%s4533_s1 + $0x60] sm:$0xff] }
   0xa   :  { %3136 = vmatpush.bf16.msra.mxu1 %v3070_v2  ;;  %3137 = vmatpush.bf16.msra.mxu2 %v3070_v2  ;;  %v3104_v28 = vld [vmem:[%s4533_s1 + $0x138] sm:$0xff]  ;;  %v3094_v32 = vld [vmem:[%s4533_s1 + $0xe8] sm:$0xff]  ;;  %v2991_v34 = vld [vmem:[%s4535_s0 + $0x130] sm:$0xf0] }
   0xb   :  { %3138 = vmatpush.bf16.msra.mxu3 %v3070_v2  ;;  %1162 = vmatpush.bf16.msra.mxu0 %v3070_v2  ;;  %v2371_v33 = vld [vmem:[%s4535_s0 + $0x118] sm:$0xf]  ;;  %v3019_v36 = vld [vmem:[%s4535_s0 + $0x210] sm:$0xf0]  ;;  %v3093_v43 = vld [vmem:[%s4533_s1 + $0xe0] sm:$0xff] }
   0xc   :  { %v2483_v35 = vld [vmem:[%s4535_s0 + $0x1f8] sm:$0xf]  ;;  %v3047_v38 = vld [vmem:[%s4535_s0 + $0x2f0] sm:$0xf0]  ;;  %v2372_v44 = vor.u32 %v2991_v34, %v2371_v33  ;;  %v3102_v51 = vld [vmem:[%s4533_s1 + $0x128] sm:$0xff] }
   0xd   :  { %v2595_v37 = vld [vmem:[%s4535_s0 + $0x2d8] sm:$0xf]  ;;  %v2963_v41 = vld [vmem:[%s4535_s0 + $0x50] sm:$0xf0]  ;;  %v2484_v45 = vor.u32 %v3019_v36, %v2483_v35  ;;  %v3082_v52 = vld [vmem:[%s4533_s1 + $0x88] sm:$0xff] }
   0xe   :  { %3139 = vmatpush.bf16.msra.mxu1 %v3069_v3  ;;  %3140 = vmatpush.bf16.msra.mxu2 %v3069_v3  ;;  %v2259_v39 = vld [vmem:[%s4535_s0 + $0x38] sm:$0xf]  ;;  %v2596_v46 = vor.u32 %v3047_v38, %v2595_v37  ;;  %v3083_v48 = vld [vmem:[%s4533_s1 + $0x90] sm:$0xff]  ;;  %v3074_v53 = vld [vmem:[%s4533_s1 + $0x48] sm:$0xff] }
   0xf   :  { %3141 = vmatpush.bf16.msra.mxu3 %v3069_v3  ;;  %1163 = vmatpush.bf16.msra.mxu0 %v3069_v3  ;;  %v3084_v40 = vld [vmem:[%s4533_s1 + $0x98] sm:$0xff]  ;;  %v2260_v47 = vor.u32 %v2963_v41, %v2259_v39  ;;  %v3075_v49 = vld [vmem:[%s4533_s1 + $0x50] sm:$0xff]  ;;  %v3101_v55 = vld [vmem:[%s4533_s1 + $0x120] sm:$0xff] }
  0x10   :  { %v3076_v42 = vld [vmem:[%s4533_s1 + $0x58] sm:$0xff]  ;;  %v3091_v54 = vld [vmem:[%s4533_s1 + $0xd0] sm:$0xff]  ;;  %v3081_v56 = vld [vmem:[%s4533_s1 + $0x80] sm:$0xff] }
  0x11   :  { %v3092_v50 = vld [vmem:[%s4533_s1 + $0xd8] sm:$0xff]  ;;  %v3090_v57 = vld [vmem:[%s4533_s1 + $0xc8] sm:$0xff]  ;;  %v3073_v58 = vld [vmem:[%s4533_s1 + $0x40] sm:$0xff] }
  0x12   :  { %3142 = vmatpush.bf16.msra.mxu1 %v3068_v4  ;;  %3143 = vmatpush.bf16.msra.mxu2 %v3068_v4  ;;  %v2399_v59 = vld [vmem:[%s4535_s0 + $0x150] sm:$0xf]  ;;  %v3100_v60 = vld [vmem:[%s4533_s1 + $0x118] sm:$0xff]  ;;  %v2998_v61 = vld [vmem:[%s4535_s0 + $0x168] sm:$0xf0] }
  0x13   :  { %3144 = vmatpush.bf16.msra.mxu3 %v3068_v4  ;;  %1164 = vmatpush.bf16.msra.mxu0 %v3068_v4  ;;  %v2511_v62 = vld [vmem:[%s4535_s0 + $0x230] sm:$0xf]  ;;  %v3026_v63 = vld [vmem:[%s4535_s0 + $0x248] sm:$0xf0]  ;;  %v3089_v4 = vld [vmem:[%s4533_s1 + $0xc0] sm:$0xff] }
  0x14   :  { %v2623_v0 = vld [vmem:[%s4535_s0 + $0x310] sm:$0xf]  ;;  %v3054_v1 = vld [vmem:[%s4535_s0 + $0x328] sm:$0xf0]  ;;  %v3113_v10 = vld [vmem:[%s4533_s1 + $0x180] sm:$0xff] }
  0x15   :  { %v2287_v2 = vld [vmem:[%s4535_s0 + $0x70] sm:$0xf]  ;;  %v2970_v3 = vld [vmem:[%s4535_s0 + $0x88] sm:$0xf0]  ;;  %v3097_v13 = vld [vmem:[%s4533_s1 + $0x100] sm:$0xff] }
  0x16   :  { %3145 = vmatpush.bf16.msra.mxu1 %v3067_v5  ;;  %3146 = vmatpush.bf16.msra.mxu2 %v3067_v5  ;;  %v3099_v8 = vld [vmem:[%s4533_s1 + $0x110] sm:$0xff]  ;;  %v2288_v9 = vor.u32 %v2970_v3, %v2287_v2  ;;  %v3098_v11 = vld [vmem:[%s4533_s1 + $0x108] sm:$0xff]  ;;  %v3033_v17 = vld [vmem:[%s4535_s0 + $0x280] sm:$0xf0] }
  0x17   :  { %3147 = vmatpush.bf16.msra.mxu3 %v3067_v5  ;;  %1165 = vmatpush.bf16.msra.mxu0 %v3067_v5  ;;  %v2400_v5 = vor.u32 %v2998_v61, %v2399_v59  ;;  %v2427_v14 = vld [vmem:[%s4535_s0 + $0x188] sm:$0xf]  ;;  %v2958_v33 = vld [vmem:[%s4535_s0 + $0x28] sm:$0xf0]  ;;  %v3111_v38 = vld [vmem:[%s4533_s1 + $0x170] sm:$0xff] }
  0x18   :  { %v2539_v16 = vld [vmem:[%s4535_s0 + $0x268] sm:$0xf]  ;;  %v2960_v39 = vld [vmem:[%s4535_s0 + $0x3c] sm:$0xf]  ;;  %v2267_v41 = vld [vmem:[%s4535_s0 + $0x40] sm:$0xf] }
  0x19   :  { %v2323_v2 = vld [vmem:[%s4535_s0 + $0xb0] sm:$0xf]  ;;  %v2978_v3 = vld [vmem:[%s4535_s0 + $0xc8] sm:$0xf0] }
  0x1a   :  { %3148 = vmatpush.bf16.msra.mxu1 %v3066_v6  ;;  %3149 = vmatpush.bf16.msra.mxu2 %v3066_v6 }
  0x1b   :  { %3150 = vmatpush.bf16.msra.mxu3 %v3066_v6  ;;  %1166 = vmatpush.bf16.msra.mxu0 %v3066_v6  ;;  %v2512_v6 = vor.u32 %v3026_v63, %v2511_v62  ;;  %v3110_v63 = vld [vmem:[%s4533_s1 + $0x168] sm:$0xff] }
  0x1e   :  { %3151 = vmatpush.bf16.msra.mxu1 %v3065_v7  ;;  %3152 = vmatpush.bf16.msra.mxu2 %v3065_v7 }
  0x1f   :  { %3153 = vmatpush.bf16.msra.mxu3 %v3065_v7  ;;  %1167 = vmatpush.bf16.msra.mxu0 %v3065_v7  ;;  %v2624_v7 = vor.u32 %v3054_v1, %v2623_v0  ;;  %v2974_v0 = vld [vmem:[%s4535_s0 + $0xac] sm:$0xf]  ;;  %v2317_v1 = vld [vmem:[%s4535_s0 + $0xc4] sm:$0xf0] }
  0x21   :  { %1188 = vmatmul.bf16.vlgmr.msra.gmra.mxu1 %v2344_v18  ;;  %1208 = vmatmul.bf16.vlgmr.msra.gmra.mxu2 %v2456_v19  ;;  %v2651_v18 = vld [vmem:[%s4535_s0 + $0x348] sm:$0xf]  ;;  %v3061_v19 = vld [vmem:[%s4535_s0 + $0x360] sm:$0xf0] }
  0x22   :  { %1338 = vmatpush.bf16.msrb.mxu2 %v3088_v12  ;;  %1249 = vmatpush.bf16.msrb.mxu1 %v3080_v15  ;;  %v3112_v12 = vld [vmem:[%s4533_s1 + $0x178] sm:$0xff]  ;;  %v3005_v15 = vld [vmem:[%s4535_s0 + $0x1a0] sm:$0xf0] }
  0x23   :  { %1228 = vmatmul.bf16.vlgmr.msra.gmra.mxu3 %v2568_v20  ;;  %1168 = vmatmul.bf16.vlgmr.msra.gmra.mxu0 %v2232_v22  ;;  %v2315_v20 = vld [vmem:[%s4535_s0 + $0xa8] sm:$0xf]  ;;  %v2428_v22 = vor.u32 %v3005_v15, %v2427_v14  ;;  %v2985_v15 = vld [vmem:[%s4535_s0 + $0x100] sm:$0xf0] }
  0x24   :  { %1427 = vmatpush.bf16.msrb.mxu3 %v3096_v24  ;;  %1516 = vmatpush.bf16.msrb.mxu0 %v3104_v28  ;;  %v2652_v24 = vor.u32 %v3061_v19, %v2651_v18  ;;  %v2239_v28 = vld [vmem:[%s4535_s0 + $0x8] sm:$0xf]  ;;  %v2359_v19 = vld [vmem:[%s4535_s0 + $0xf0] sm:$0xf] }
  0x25   :  { %v2351_v14 = vld [vmem:[%s4535_s0 + $0xe8] sm:$0xf] }
  0x26   :  { %1339 = vmatpush.bf16.msrb.mxu2 %v3087_v21  ;;  %1250 = vmatpush.bf16.msrb.mxu1 %v3079_v23  ;;  %v2977_v21 = vld [vmem:[%s4535_s0 + $0xc0] sm:$0xf0]  ;;  %v2540_v23 = vor.u32 %v3033_v17, %v2539_v16  ;;  %v3536_v16 = vld [vmem:[%s4534_s2] ss:$0 sm:$0xff]  ;;  %v2982_v17 = vld [vmem:[%s4535_s0 + $0xec] sm:$0xf] }
  0x27   :  { %v2353_v18 = vld [vmem:[%s4535_s0 + $0x104] sm:$0xf0] }
  0x28   :  { %1428 = vmatpush.bf16.msrb.mxu3 %v3095_v27  ;;  %1517 = vmatpush.bf16.msrb.mxu0 %v3103_v29  ;;  %v2233_v27 = vld [vmem:[%s4535_s0 + $0x1c] sm:$0xf0]  ;;  %v2957_v29 = vld [vmem:[%s4535_s0 + $0x20] sm:$0xf0] }
  0x29   :  { %v2240_v35 = vor.u32 %v2957_v29, %v2239_v28 }
  0x2a   :  { %1340 = vmatpush.bf16.msrb.mxu2 %v3086_v25  ;;  %1251 = vmatpush.bf16.msrb.mxu1 %v3078_v26  ;;  %v2316_v25 = vor.u32 %v2977_v21, %v2315_v20  ;;  %v2953_v26 = vld [vmem:[%s4535_s0 + $0x4] sm:$0xf]  ;;  %v2986_v20 = vld [vmem:[%s4535_s0 + $0x108] sm:$0xf0] }
  0x2b   :  { %v2236_v34 = vor.u32 %v2953_v26, %v2233_v27  ;;  %v2360_v26 = vor.u32 %v2986_v20, %v2359_v19 }
  0x2c   :  { %1429 = vmatpush.bf16.msrb.mxu3 %v3094_v32  ;;  %1518 = vmatpush.bf16.msrb.mxu0 %v3102_v51  ;;  %v2247_v32 = vld [vmem:[%s4535_s0 + $0x10] sm:$0xf]  ;;  %v2967_v51 = vld [vmem:[%s4535_s0 + $0x74] sm:$0xf] }
  0x2d   :  { %v2248_v37 = vor.u32 %v2958_v33, %v2247_v32 }
  0x2e   :  { %1341 = vmatpush.bf16.msrb.mxu2 %v3085_v30  ;;  %1252 = vmatpush.bf16.msrb.mxu1 %v3077_v31  ;;  %v2954_v30 = vld [vmem:[%s4535_s0 + $0xc] sm:$0xf]  ;;  %v2241_v31 = vld [vmem:[%s4535_s0 + $0x24] sm:$0xf0] }
  0x2f   :  { %v2244_v36 = vor.u32 %v2954_v30, %v2241_v31  ;;  %v3109_v31 = vld [vmem:[%s4533_s1 + $0x160] sm:$0xff] }
  0x30   :  { %1430 = vmatpush.bf16.msrb.mxu3 %v3093_v43  ;;  %1519 = vmatpush.bf16.msrb.mxu0 %v3101_v55  ;;  %v2961_v43 = vld [vmem:[%s4535_s0 + $0x44] sm:$0xf]  ;;  %v2968_v55 = vld [vmem:[%s4535_s0 + $0x7c] sm:$0xf] }
  0x31   :  { %1193 = vmatmul.bf16.gmra.mxu1 %v2372_v44  ;;  %1213 = vmatmul.bf16.gmra.mxu2 %v2484_v45  ;;  %v2269_v44 = vld [vmem:[%s4535_s0 + $0x5c] sm:$0xf0]  ;;  %v2275_v45 = vld [vmem:[%s4535_s0 + $0x48] sm:$0xf] }
  0x32   :  { %1342 = vmatpush.bf16.msrb.mxu2 %v3084_v40  ;;  %1253 = vmatpush.bf16.msrb.mxu1 %v3076_v42  ;;  %v2261_v40 = vld [vmem:[%s4535_s0 + $0x54] sm:$0xf0]  ;;  %v2964_v42 = vld [vmem:[%s4535_s0 + $0x58] sm:$0xf0] }
  0x33   :  { %1233 = vmatmul.bf16.gmra.mxu3 %v2596_v46  ;;  %1173 = vmatmul.bf16.gmra.mxu0 %v2260_v47  ;;  %v2965_v46 = vld [vmem:[%s4535_s0 + $0x60] sm:$0xf0]  ;;  %v2264_v47 = vor.u32 %v2960_v39, %v2261_v40  ;;  %v2992_v39 = vld [vmem:[%s4535_s0 + $0x138] sm:$0xf0] }
  0x34   :  { %1431 = vmatpush.bf16.msrb.mxu3 %v3092_v50  ;;  %1520 = vmatpush.bf16.msrb.mxu0 %v3100_v60  ;;  %v2276_v50 = vor.u32 %v2965_v46, %v2275_v45  ;;  %v2989_v40 = vld [vmem:[%s4535_s0 + $0x124] sm:$0xf] }
  0x36   :  { %1343 = vmatpush.bf16.msrb.mxu2 %v3083_v48  ;;  %1254 = vmatpush.bf16.msrb.mxu1 %v3075_v49  ;;  %v2268_v48 = vor.u32 %v2964_v42, %v2267_v41  ;;  %v2272_v49 = vor.u32 %v2961_v43, %v2269_v44  ;;  %v2381_v41 = vld [vmem:[%s4535_s0 + $0x13c] sm:$0xf0]  ;;  %v2387_v43 = vld [vmem:[%s4535_s0 + $0x128] sm:$0xf]  ;;  %v2993_v44 = vld [vmem:[%s4535_s0 + $0x140] sm:$0xf0] }
  0x38   :  { %1432 = vmatpush.bf16.msrb.mxu3 %v3091_v54  ;;  %1521 = vmatpush.bf16.msrb.mxu0 %v3099_v8  ;;  %v2971_v54 = vld [vmem:[%s4535_s0 + $0x90] sm:$0xf0]  ;;  %v2320_v8 = vor.u32 %v2974_v0, %v2317_v1  ;;  %v2407_v0 = vld [vmem:[%s4535_s0 + $0x158] sm:$0xf] }
  0x39   :  { %v2999_v1 = vld [vmem:[%s4535_s0 + $0x170] sm:$0xf0] }
  0x3a   :  { %1344 = vmatpush.bf16.msrb.mxu2 %v3082_v52  ;;  %1255 = vmatpush.bf16.msrb.mxu1 %v3074_v53  ;;  %v2289_v52 = vld [vmem:[%s4535_s0 + $0x8c] sm:$0xf0]  ;;  %v2295_v53 = vld [vmem:[%s4535_s0 + $0x78] sm:$0xf] }
  0x3b   :  { %v2292_v59 = vor.u32 %v2967_v51, %v2289_v52  ;;  %v2296_v60 = vor.u32 %v2971_v54, %v2295_v53  ;;  %v2384_v51 = vor.u32 %v2989_v40, %v2381_v41  ;;  %v2388_v53 = vor.u32 %v2993_v44, %v2387_v43  ;;  %v3007_v40 = vld [vmem:[%s4535_s0 + $0x1b0] sm:$0xf0] }
  0x3c   :  { %1433 = vmatpush.bf16.msrb.mxu3 %v3090_v57  ;;  %1522 = vmatpush.bf16.msrb.mxu0 %v3098_v11  ;;  %v2303_v57 = vld [vmem:[%s4535_s0 + $0x80] sm:$0xf] }
  0x3e   :  { %1345 = vmatpush.bf16.msrb.mxu2 %v3081_v56  ;;  %1256 = vmatpush.bf16.msrb.mxu1 %v3073_v58  ;;  %v2297_v56 = vld [vmem:[%s4535_s0 + $0x94] sm:$0xf0]  ;;  %v2972_v58 = vld [vmem:[%s4535_s0 + $0x98] sm:$0xf0] }
  0x3f   :  { %v2300_v61 = vor.u32 %v2968_v55, %v2297_v56  ;;  %v2304_v62 = vor.u32 %v2972_v58, %v2303_v57 }
  0x40   :  { %1434 = vmatpush.bf16.msrb.mxu3 %v3089_v4  ;;  %1523 = vmatpush.bf16.msrb.mxu0 %v3097_v13  ;;  %v2975_v4 = vld [vmem:[%s4535_s0 + $0xb4] sm:$0xf]  ;;  %v2345_v13 = vld [vmem:[%s4535_s0 + $0xfc] sm:$0xf0] }
  0x41   :  { %1198 = vmatmul.bf16.gmra.mxu1 %v2400_v5  ;;  %1218 = vmatmul.bf16.gmra.mxu2 %v2512_v6  ;;  %v2325_v5 = vld [vmem:[%s4535_s0 + $0xcc] sm:$0xf0]  ;;  %v2331_v6 = vld [vmem:[%s4535_s0 + $0xb8] sm:$0xf] }
  0x42   :  { %1701 = vmatpush.bf16.msra.mxu2 %v3113_v10  ;;  %1605 = vmatpush.bf16.msra.mxu1 %v3112_v12  ;;  %v2328_v10 = vor.u32 %v2975_v4, %v2325_v5  ;;  %v2981_v12 = vld [vmem:[%s4535_s0 + $0xe4] sm:$0xf]  ;;  %v2415_v5 = vld [vmem:[%s4535_s0 + $0x160] sm:$0xf] }
  0x43   :  { %1238 = vmatmul.bf16.gmra.mxu3 %v2624_v7  ;;  %1178 = vmatmul.bf16.gmra.mxu0 %v2288_v9  ;;  %v2979_v7 = vld [vmem:[%s4535_s0 + $0xd0] sm:$0xf0]  ;;  %v2324_v9 = vor.u32 %v2978_v3, %v2323_v2  ;;  %v2348_v21 = vor.u32 %v2981_v12, %v2345_v13  ;;  %v2996_v2 = vld [vmem:[%s4535_s0 + $0x15c] sm:$0xf]  ;;  %v2409_v3 = vld [vmem:[%s4535_s0 + $0x174] sm:$0xf0] }
  0x44   :  { %v2332_v11 = vor.u32 %v2979_v7, %v2331_v6  ;;  %v3000_v6 = vld [vmem:[%s4535_s0 + $0x178] sm:$0xf0]  ;;  %v2412_v13 = vor.u32 %v2996_v2, %v2409_v3  ;;  %v3009_v3 = vld [vmem:[%s4535_s0 + $0x1c4] sm:$0xf] }
  0x46   :  { %1606 = vmatpush.bf16.msra.mxu1 %v3111_v38  ;;  %v2379_v38 = vld [vmem:[%s4535_s0 + $0x120] sm:$0xf] }
  0x4a   :  { %1607 = vmatpush.bf16.msra.mxu1 %v3110_v63  ;;  %v2401_v63 = vld [vmem:[%s4535_s0 + $0x16c] sm:$0xf0] }
  0x4e   :  { %1608 = vmatpush.bf16.msra.mxu1 %v3109_v31  ;;  %v2435_v31 = vld [vmem:[%s4535_s0 + $0x190] sm:$0xf] }
  0x51   :  { %1203 = vmatmul.bf16.gmra.mxu1 %v2428_v22  ;;  %1223 = vmatmul.bf16.gmra.mxu2 %v2540_v23  ;;  %v2352_v22 = vor.u32 %v2985_v15, %v2351_v14  ;;  %v2416_v15 = vor.u32 %v3000_v6, %v2415_v5  ;;  %v2463_v5 = vld [vmem:[%s4535_s0 + $0x1c8] sm:$0xf]  ;;  %v3013_v6 = vld [vmem:[%s4535_s0 + $0x1e0] sm:$0xf0] }
  0x53   :  { %1243 = vmatmul.bf16.gmra.mxu3 %v2652_v24  ;;  %1183 = vmatmul.bf16.gmra.mxu0 %v2316_v25  ;;  %v2356_v24 = vor.u32 %v2982_v17, %v2353_v18 }
  0x61   :  { %1257 = vmatmul.bf16.vlgmr.msrb.gmra.mxu1 %v2236_v34  ;;  %1346 = vmatmul.bf16.vlgmr.msrb.gmra.mxu2 %v2240_v35 }
  0x63   :  { %1435 = vmatmul.bf16.vlgmr.msrb.gmra.mxu3 %v2244_v36  ;;  %1524 = vmatmul.bf16.vlgmr.msrb.gmra.mxu0 %v2248_v37  ;;  %v2988_v36 = vld [vmem:[%s4535_s0 + $0x11c] sm:$0xf]  ;;  %v2373_v37 = vld [vmem:[%s4535_s0 + $0x134] sm:$0xf0] }
  0x71   :  { %1262 = vmatmul.bf16.gmra.mxu1 %v2264_v47  ;;  %1351 = vmatmul.bf16.gmra.mxu2 %v2268_v48  ;;  %v2376_v47 = vor.u32 %v2988_v36, %v2373_v37  ;;  %v2380_v48 = vor.u32 %v2992_v39, %v2379_v38  ;;  %v3003_v36 = vld [vmem:[%s4535_s0 + $0x194] sm:$0xf]  ;;  %v2437_v37 = vld [vmem:[%s4535_s0 + $0x1ac] sm:$0xf0]  ;;  %v2443_v39 = vld [vmem:[%s4535_s0 + $0x198] sm:$0xf] }
  0x73   :  { %1440 = vmatmul.bf16.gmra.mxu3 %v2272_v49  ;;  %1529 = vmatmul.bf16.gmra.mxu0 %v2276_v50 }
  0x81   :  { %1267 = vmatmul.bf16.gmra.mxu1 %v2292_v59  ;;  %1356 = vmatmul.bf16.gmra.mxu2 %v2296_v60 }
  0x83   :  { %1445 = vmatmul.bf16.gmra.mxu3 %v2300_v61  ;;  %1534 = vmatmul.bf16.gmra.mxu0 %v2304_v62  ;;  %v2995_v62 = vld [vmem:[%s4535_s0 + $0x154] sm:$0xf] }
  0x91   :  { %1272 = vmatmul.bf16.gmra.mxu1 %v2320_v8  ;;  %1361 = vmatmul.bf16.gmra.mxu2 %v2324_v9  ;;  %v2404_v9 = vor.u32 %v2995_v62, %v2401_v63 }
  0x93   :  { %1450 = vmatmul.bf16.gmra.mxu3 %v2328_v10  ;;  %1539 = vmatmul.bf16.gmra.mxu0 %v2332_v11  ;;  %v2408_v10 = vor.u32 %v2999_v1, %v2407_v0 }
  0x9e   :  { %v1189_v23 = vpop.f32.mrf.mxu1 }
  0x9f   :  { %v3551_v25 = vadd.f32 %v3536_v16, %v1189_v23 }
  0xa0   :  { %v3553_v27 = vpop.f32.mrf.mxu0 }
  0xa1   :  { %1277 = vmatmul.bf16.gmra.mxu1 %v2348_v21  ;;  %1366 = vmatmul.bf16.gmra.mxu2 %v2352_v22  ;;  %v3108_v21 = vld [vmem:[%s4533_s1 + $0x158] sm:$0xff] }
  0xa2   :  { %1609 = vmatpush.bf16.msra.mxu1 %v3108_v21  ;;  %v2464_v21 = vor.u32 %v3013_v6, %v2463_v5  ;;  %v2499_v6 = vld [vmem:[%s4535_s0 + $0x208] sm:$0xf] }
  0xa3   :  { %1455 = vmatmul.bf16.gmra.mxu3 %v2356_v24  ;;  %1544 = vmatmul.bf16.gmra.mxu0 %v2360_v26 }
  0xa4   :  { %v1209_v28 = vpop.f32.mrf.mxu2 }
  0xa5   :  { %v3556_v29 = vadd.f32 %v3536_v16, %v1209_v28  ;;  %v3002_v28 = vld [vmem:[%s4535_s0 + $0x18c] sm:$0xf] }
  0xa6   :  { %v1229_v30 = vpop.f32.mrf.mxu3  ;;  %v1191_v32 = vpop.f32.mrf.mxu1 }
  0xa7   :  { %v3562_v33 = vadd.f32 %v3536_v16, %v1229_v30  ;;  %v3565_v34 = vadd.f32 %v3536_v16, %v1191_v32  ;;  %v2429_v30 = vld [vmem:[%s4535_s0 + $0x1a4] sm:$0xf0]  ;;  %v3006_v32 = vld [vmem:[%s4535_s0 + $0x1a8] sm:$0xf0] }
  0xa8   :  { %v3567_v35 = vpop.f32.mrf.mxu0  ;;  %v2432_v43 = vor.u32 %v3002_v28, %v2429_v30  ;;  %v2436_v44 = vor.u32 %v3006_v32, %v2435_v31 }
  0xac   :  { %v1211_v42 = vpop.f32.mrf.mxu2 }
  0xad   :  { %v3594_v45 = vadd.f32 %v3536_v16, %v1211_v42 }
  0xae   :  { %v1231_v46 = vpop.f32.mrf.mxu3  ;;  %v1194_v49 = vpop.f32.mrf.mxu1 }
  0xaf   :  { %v3597_v50 = vadd.f32 %v3536_v16, %v1231_v46  ;;  %v3600_v52 = vadd.f32 %v3536_v16, %v1194_v49 }
  0xb0   :  { %v3602_v54 = vpop.f32.mrf.mxu0 }
  0xb1   :  { %1282 = vmatmul.bf16.gmra.mxu1 %v2376_v47  ;;  %1371 = vmatmul.bf16.gmra.mxu2 %v2380_v48  ;;  %v2440_v48 = vor.u32 %v3003_v36, %v2437_v37  ;;  %v1172_v37 = vadd.f32 %v3536_v16, %v3567_v35  ;;  %v2485_v35 = vld [vmem:[%s4535_s0 + $0x214] sm:$0xf0] }
  0xb3   :  { %1460 = vmatmul.bf16.gmra.mxu3 %v2384_v51  ;;  %1549 = vmatmul.bf16.gmra.mxu0 %v2388_v53  ;;  %v2444_v51 = vor.u32 %v3007_v40, %v2443_v39 }
  0xb4   :  { %v1214_v55 = vpop.f32.mrf.mxu2 }
  0xb5   :  { %v3605_v56 = vadd.f32 %v3536_v16, %v1214_v55  ;;  %v3121_v55 = vld [vmem:[%s4536_s3 + $0x38] sm:$0xff] }
  0xb6   :  { %v1234_v57 = vpop.f32.mrf.mxu3  ;;  %v1196_v58 = vpop.f32.mrf.mxu1  ;;  %1899 = vmatpush.bf16.msra.mxu3 %v3121_v55  ;;  %v3016_v55 = vld [vmem:[%s4535_s0 + $0x1fc] sm:$0xf] }
  0xb7   :  { %v3608_v59 = vadd.f32 %v3536_v16, %v1234_v57  ;;  %v3611_v60 = vadd.f32 %v3536_v16, %v1196_v58 }
  0xb8   :  { %v3613_v61 = vpop.f32.mrf.mxu0 }
  0xbc   :  { %v1216_v4 = vpop.f32.mrf.mxu2 }
  0xbd   :  { %v3640_v7 = vadd.f32 %v3536_v16, %v1216_v4  ;;  %v2457_v4 = vld [vmem:[%s4535_s0 + $0x1dc] sm:$0xf0] }
  0xbe   :  { %v1236_v8 = vpop.f32.mrf.mxu3  ;;  %v1199_v11 = vpop.f32.mrf.mxu1 }
  0xbf   :  { %v3643_v12 = vadd.f32 %v3536_v16, %v1236_v8  ;;  %v3646_v14 = vadd.f32 %v3536_v16, %v1199_v11  ;;  %v1170_v8 = vadd.f32 %v3536_v16, %v3553_v27 }
  0xc0   :  { %v3648_v17 = vpop.f32.mrf.mxu0 }
  0xc1   :  { %1287 = vmatmul.bf16.gmra.mxu1 %v2404_v9  ;;  %1376 = vmatmul.bf16.gmra.mxu2 %v2408_v10  ;;  %v3010_v9 = vld [vmem:[%s4535_s0 + $0x1cc] sm:$0xf]  ;;  %v2465_v10 = vld [vmem:[%s4535_s0 + $0x1e4] sm:$0xf0] }
  0xc2   :  { %v2468_v30 = vor.u32 %v3010_v9, %v2465_v10 }
  0xc3   :  { %1465 = vmatmul.bf16.gmra.mxu3 %v2412_v13  ;;  %1554 = vmatmul.bf16.gmra.mxu0 %v2416_v15  ;;  %v2471_v13 = vld [vmem:[%s4535_s0 + $0x1d0] sm:$0xf]  ;;  %v3014_v15 = vld [vmem:[%s4535_s0 + $0x1e8] sm:$0xf0] }
  0xc4   :  { %v1219_v18 = vpop.f32.mrf.mxu2  ;;  %v2472_v32 = vor.u32 %v3014_v15, %v2471_v13 }
  0xc5   :  { %v3651_v19 = vadd.f32 %v3536_v16, %v1219_v18 }
  0xc6   :  { %v1239_v20 = vpop.f32.mrf.mxu3  ;;  %v1201_v22 = vpop.f32.mrf.mxu1 }
  0xc7   :  { %v3657_v23 = vadd.f32 %v3536_v16, %v1239_v20  ;;  %v3660_v24 = vadd.f32 %v3536_v16, %v1201_v22  ;;  %v2460_v20 = vor.u32 %v3009_v3, %v2457_v4  ;;  %v3017_v3 = vld [vmem:[%s4535_s0 + $0x204] sm:$0xf]  ;;  %v2493_v4 = vld [vmem:[%s4535_s0 + $0x21c] sm:$0xf0] }
  0xc8   :  { %v3662_v26 = vpop.f32.mrf.mxu0  ;;  %v2496_v15 = vor.u32 %v3017_v3, %v2493_v4  ;;  %v2527_v3 = vld [vmem:[%s4535_s0 + $0x240] sm:$0xf]  ;;  %v3028_v4 = vld [vmem:[%s4535_s0 + $0x258] sm:$0xf0] }
  0xcc   :  { %v1221_v38 = vpop.f32.mrf.mxu2 }
  0xcd   :  { %v3689_v41 = vadd.f32 %v3536_v16, %v1221_v38 }
  0xce   :  { %v1241_v42 = vpop.f32.mrf.mxu3  ;;  %v1204_v46 = vpop.f32.mrf.mxu1 }
  0xcf   :  { %v3692_v47 = vadd.f32 %v3536_v16, %v1241_v42  ;;  %v3695_v49 = vadd.f32 %v3536_v16, %v1204_v46  ;;  %v3107_v42 = vld [vmem:[%s4533_s1 + $0x150] sm:$0xff] }
  0xd0   :  { %v3697_v53 = vpop.f32.mrf.mxu0  ;;  %1610 = vmatpush.bf16.msra.mxu1 %v3107_v42 }
  0xd1   :  { %1292 = vmatmul.bf16.gmra.mxu1 %v2432_v43  ;;  %1381 = vmatmul.bf16.gmra.mxu2 %v2436_v44 }
  0xd3   :  { %1470 = vmatmul.bf16.gmra.mxu3 %v2440_v48  ;;  %1559 = vmatmul.bf16.gmra.mxu0 %v2444_v51 }
  0xd4   :  { %v1224_v57 = vpop.f32.mrf.mxu2 }
  0xd5   :  { %v3703_v58 = vadd.f32 %v3536_v16, %v1224_v57  ;;  %v2491_v57 = vld [vmem:[%s4535_s0 + $0x200] sm:$0xf] }
  0xd6   :  { %v1244_v62 = vpop.f32.mrf.mxu3  ;;  %v1206_v63 = vpop.f32.mrf.mxu1 }
  0xd7   :  { %v3706_v0 = vadd.f32 %v3536_v16, %v1244_v62  ;;  %v3709_v1 = vadd.f32 %v3536_v16, %v1206_v63  ;;  %v3020_v62 = vld [vmem:[%s4535_s0 + $0x218] sm:$0xf0]  ;;  %v1175_v63 = vadd.f32 %v3536_v16, %v3602_v54  ;;  %v2488_v54 = vor.u32 %v3016_v55, %v2485_v35  ;;  %v3027_v55 = vld [vmem:[%s4535_s0 + $0x250] sm:$0xf0] }
  0xd8   :  { %v3711_v2 = vpop.f32.mrf.mxu0  ;;  %v1180_v35 = vadd.f32 %v3536_v16, %v3648_v17 }
  0xdc   :  { %v1226_v11 = vpop.f32.mrf.mxu2 }
  0xdd   :  { %v3740_v18 = vadd.f32 %v3536_v16, %v1226_v11  ;;  %v2492_v11 = vor.u32 %v3020_v62, %v2491_v57  ;;  %v3024_v57 = vld [vmem:[%s4535_s0 + $0x23c] sm:$0xf]  ;;  %v2521_v62 = vld [vmem:[%s4535_s0 + $0x254] sm:$0xf0] }
  0xde   :  { %v1246_v27 = vpop.f32.mrf.mxu3  ;;  %v1258_v28 = vpop.f32.mrf.mxu1 }
  0xdf   :  { %v3743_v22 = vadd.f32 %v3536_v16, %v1246_v27  ;;  %v1259_v31 = vadd.f32 %v1258_v28, %v1170_v8  ;;  %v3021_v8 = vld [vmem:[%s4535_s0 + $0x220] sm:$0xf0] }
  0xe0   :  { %v1525_v36 = vpop.f32.mrf.mxu0 }
  0xe1   :  { %1297 = vmatmul.bf16.gmra.mxu1 %v2460_v20  ;;  %1386 = vmatmul.bf16.gmra.mxu2 %v2464_v21  ;;  %v2500_v21 = vor.u32 %v3021_v8, %v2499_v6 }
  0xe3   :  { %1475 = vmatmul.bf16.gmra.mxu3 %v2468_v30  ;;  %1564 = vmatmul.bf16.gmra.mxu0 %v2472_v32  ;;  %v1177_v32 = vadd.f32 %v3536_v16, %v3613_v61  ;;  %v2519_v61 = vld [vmem:[%s4535_s0 + $0x238] sm:$0xf] }
  0xe4   :  { %v1347_v38 = vpop.f32.mrf.mxu2  ;;  %v2520_v8 = vor.u32 %v3027_v55, %v2519_v61  ;;  %v3031_v61 = vld [vmem:[%s4535_s0 + $0x274] sm:$0xf]  ;;  %v2549_v55 = vld [vmem:[%s4535_s0 + $0x28c] sm:$0xf0] }
  0xe5   :  { %v1348_v39 = vadd.f32 %v1347_v38, %v1259_v31  ;;  %v3120_v31 = vld [vmem:[%s4536_s3 + $0x30] sm:$0xff] }
  0xe6   :  { %v1436_v40 = vpop.f32.mrf.mxu3  ;;  %v1260_v43 = vpop.f32.mrf.mxu1  ;;  %1900 = vmatpush.bf16.msra.mxu3 %v3120_v31 }
  0xe7   :  { %v1261_v44 = vadd.f32 %v1260_v43, %v1172_v37  ;;  %v1437_v46 = vadd.f32 %v1436_v40, %v1348_v39 }
  0xe8   :  { %v1527_v48 = vpop.f32.mrf.mxu0 }
  0xe9   :  { %v3750_v51 = vadd.f32 %v1525_v36, %v1437_v46  ;;  %v3023_v46 = vld [vmem:[%s4535_s0 + $0x234] sm:$0xf] }
  0xec   :  { %v1349_v5 = vpop.f32.mrf.mxu2 }
  0xed   :  { %v1350_v9 = vadd.f32 %v1349_v5, %v1261_v44 }
  0xee   :  { %v1438_v10 = vpop.f32.mrf.mxu3  ;;  %v1263_v13 = vpop.f32.mrf.mxu1 }
  0xef   :  { %v1264_v27 = vadd.f32 %v1263_v13, %v1175_v63  ;;  %v1439_v20 = vadd.f32 %v1438_v10, %v1350_v9  ;;  %v2524_v10 = vor.u32 %v3024_v57, %v2521_v62  ;;  %v2528_v13 = vor.u32 %v3028_v4, %v2527_v3  ;;  %v2555_v57 = vld [vmem:[%s4535_s0 + $0x278] sm:$0xf]  ;;  %v3035_v62 = vld [vmem:[%s4535_s0 + $0x290] sm:$0xf0] }
  0xf0   :  { %v1530_v28 = vpop.f32.mrf.mxu0 }
  0xf1   :  { %v3778_v30 = vadd.f32 %v1527_v48, %v1439_v20  ;;  %1302 = vmatmul.bf16.gmra.mxu1 %v2488_v54  ;;  %1391 = vmatmul.bf16.gmra.mxu2 %v2492_v11  ;;  %v2513_v48 = vld [vmem:[%s4535_s0 + $0x24c] sm:$0xf0]  ;;  %v1182_v20 = vadd.f32 %v3536_v16, %v3662_v26  ;;  %v2541_v26 = vld [vmem:[%s4535_s0 + $0x284] sm:$0xf0] }
  0xf2   :  { %v2516_v17 = vor.u32 %v3023_v46, %v2513_v48  ;;  %v3034_v46 = vld [vmem:[%s4535_s0 + $0x288] sm:$0xf0]  ;;  %v1185_v48 = vadd.f32 %v3536_v16, %v3697_v53 }
  0xf3   :  { %1480 = vmatmul.bf16.gmra.mxu3 %v2496_v15  ;;  %1569 = vmatmul.bf16.gmra.mxu0 %v2500_v21 }
  0xf4   :  { %v1352_v36 = vpop.f32.mrf.mxu2 }
  0xf5   :  { %v1353_v37 = vadd.f32 %v1352_v36, %v1264_v27 }
  0xf6   :  { %v1441_v38 = vpop.f32.mrf.mxu3  ;;  %v1265_v39 = vpop.f32.mrf.mxu1 }
  0xf7   :  { %v1266_v40 = vadd.f32 %v1265_v39, %v1177_v32  ;;  %v1442_v42 = vadd.f32 %v1441_v38, %v1353_v37  ;;  %v3106_v32 = vld [vmem:[%s4533_s1 + $0x148] sm:$0xff] }
  0xf8   :  { %v1532_v43 = vpop.f32.mrf.mxu0  ;;  %1611 = vmatpush.bf16.msra.mxu1 %v3106_v32 }
  0xf9   :  { %v3785_v44 = vadd.f32 %v1530_v28, %v1442_v42 }
  0xfc   :  { %v1354_v63 = vpop.f32.mrf.mxu2 }
  0xfd   :  { %v1355_v5 = vadd.f32 %v1354_v63, %v1266_v40  ;;  %v3030_v40 = vld [vmem:[%s4535_s0 + $0x26c] sm:$0xf] }
  0xfe   :  { %v1443_v6 = vpop.f32.mrf.mxu3  ;;  %v1268_v9 = vpop.f32.mrf.mxu1  ;;  %v2544_v53 = vor.u32 %v3030_v40, %v2541_v26  ;;  %v3038_v40 = vld [vmem:[%s4535_s0 + $0x2ac] sm:$0xf] }
  0xff   :  { %v1269_v54 = vadd.f32 %v1268_v9, %v1180_v35  ;;  %v1444_v11 = vadd.f32 %v1443_v6, %v1355_v5  ;;  %v2552_v6 = vor.u32 %v3031_v61, %v2549_v55  ;;  %v2556_v9 = vor.u32 %v3035_v62, %v2555_v57 }
 0x100   :  { %v1535_v15 = vpop.f32.mrf.mxu0 }
 0x101   :  { %v3813_v27 = vadd.f32 %v1532_v43, %v1444_v11  ;;  %1307 = vmatmul.bf16.gmra.mxu1 %v2516_v17  ;;  %1396 = vmatmul.bf16.gmra.mxu2 %v2520_v8  ;;  %v2547_v43 = vld [vmem:[%s4535_s0 + $0x270] sm:$0xf]  ;;  %v1187_v11 = vadd.f32 %v3536_v16, %v3711_v2  ;;  %v2575_v16 = vld [vmem:[%s4535_s0 + $0x2a8] sm:$0xf]  ;;  %v3041_v2 = vld [vmem:[%s4535_s0 + $0x2c0] sm:$0xf0] }
 0x102   :  { %v2548_v4 = vor.u32 %v3034_v46, %v2547_v43  ;;  %v2583_v43 = vld [vmem:[%s4535_s0 + $0x2b0] sm:$0xf]  ;;  %v3042_v46 = vld [vmem:[%s4535_s0 + $0x2c8] sm:$0xf0] }
 0x103   :  { %1485 = vmatmul.bf16.gmra.mxu3 %v2524_v10  ;;  %1574 = vmatmul.bf16.gmra.mxu0 %v2528_v13 }
 0x104   :  { %v1357_v21 = vpop.f32.mrf.mxu2 }
 0x105   :  { %v1358_v28 = vadd.f32 %v1357_v21, %v1269_v54  ;;  %v3119_v54 = vld [vmem:[%s4536_s3 + $0x28] sm:$0xff] }
 0x106   :  { %v1446_v31 = vpop.f32.mrf.mxu3  ;;  %v1270_v36 = vpop.f32.mrf.mxu1  ;;  %1901 = vmatpush.bf16.msra.mxu3 %v3119_v54 }
 0x107   :  { %v1271_v37 = vadd.f32 %v1270_v36, %v1182_v20  ;;  %v1447_v38 = vadd.f32 %v1446_v31, %v1358_v28 }
 0x108   :  { %v1537_v42 = vpop.f32.mrf.mxu0 }
 0x109   :  { %v3820_v39 = vadd.f32 %v1535_v15, %v1447_v38  ;;  %v2569_v38 = vld [vmem:[%s4535_s0 + $0x2bc] sm:$0xf0] }
 0x10c   :  { %v1359_v35 = vpop.f32.mrf.mxu2 }
 0x10d   :  { %v1360_v63 = vadd.f32 %v1359_v35, %v1271_v37  ;;  %v3037_v37 = vld [vmem:[%s4535_s0 + $0x2a4] sm:$0xf]  ;;  %v2576_v35 = vor.u32 %v3041_v2, %v2575_v16 }
 0x10e   :  { %v1448_v3 = vpop.f32.mrf.mxu3  ;;  %v1273_v5 = vpop.f32.mrf.mxu1  ;;  %v2572_v55 = vor.u32 %v3037_v37, %v2569_v38  ;;  %v3049_v37 = vld [vmem:[%s4535_s0 + $0x300] sm:$0xf0] }
 0x10f   :  { %v1274_v17 = vadd.f32 %v1273_v5, %v1185_v48  ;;  %v1449_v8 = vadd.f32 %v1448_v3, %v1360_v63 }
 0x110   :  { %v1540_v15 = vpop.f32.mrf.mxu0 }
 0x111   :  { %v3848_v10 = vadd.f32 %v1537_v42, %v1449_v8  ;;  %1312 = vmatmul.bf16.gmra.mxu1 %v2544_v53  ;;  %1401 = vmatmul.bf16.gmra.mxu2 %v2548_v4  ;;  %v2577_v42 = vld [vmem:[%s4535_s0 + $0x2c4] sm:$0xf0]  ;;  %v2584_v4 = vor.u32 %v3042_v46, %v2583_v43 }
 0x112   :  { %v2580_v63 = vor.u32 %v3038_v40, %v2577_v42 }
 0x113   :  { %1490 = vmatmul.bf16.gmra.mxu3 %v2552_v6  ;;  %1579 = vmatmul.bf16.gmra.mxu0 %v2556_v9  ;;  %v3105_v9 = vld [vmem:[%s4533_s1 + $0x140] sm:$0xff] }
 0x114   :  { %v1362_v13 = vpop.f32.mrf.mxu2  ;;  %1612 = vmatpush.bf16.msra.mxu1 %v3105_v9  ;;  %v3056_v9 = vld [vmem:[%s4535_s0 + $0x338] sm:$0xf0] }
 0x115   :  { %v1363_v20 = vadd.f32 %v1362_v13, %v1274_v17 }
 0x116   :  { %v1451_v21 = vpop.f32.mrf.mxu3  ;;  %v1275_v28 = vpop.f32.mrf.mxu1 }
 0x117   :  { %v1276_v31 = vadd.f32 %v1275_v28, %v1187_v11  ;;  %v1452_v32 = vadd.f32 %v1451_v21, %v1363_v20  ;;  %v2603_v20 = vld [vmem:[%s4535_s0 + $0x2e0] sm:$0xf]  ;;  %v3048_v21 = vld [vmem:[%s4535_s0 + $0x2f8] sm:$0xf0] }
 0x118   :  { %v1542_v62 = vpop.f32.mrf.mxu0  ;;  %v2605_v28 = vld [vmem:[%s4535_s0 + $0x2fc] sm:$0xf0]  ;;  %v2604_v40 = vor.u32 %v3048_v21, %v2603_v20 }
 0x119   :  { %v3855_v36 = vadd.f32 %v1540_v15, %v1452_v32  ;;  %v2597_v15 = vld [vmem:[%s4535_s0 + $0x2f4] sm:$0xf0]  ;;  %v2611_v32 = vld [vmem:[%s4535_s0 + $0x2e8] sm:$0xf] }
 0x11a   :  { %v2612_v46 = vor.u32 %v3049_v37, %v2611_v32 }
 0x11c   :  { %v1364_v26 = vpop.f32.mrf.mxu2 }
 0x11d   :  { %v1365_v48 = vadd.f32 %v1364_v26, %v1276_v31 }
 0x11e   :  { %v1453_v61 = vpop.f32.mrf.mxu3  ;;  %v1278_v57 = vpop.f32.mrf.mxu1 }
 0x11f   :  { %v1279_v3 = vadd.f32 %v1278_v57, %v3551_v25  ;;  %v1454_v53 = vadd.f32 %v1453_v61, %v1365_v48  ;;  %v3044_v25 = vld [vmem:[%s4535_s0 + $0x2dc] sm:$0xf]  ;;  %v3118_v48 = vld [vmem:[%s4536_s3 + $0x20] sm:$0xff] }
 0x120   :  { %v2600_v2 = vor.u32 %v3044_v25, %v2597_v15  ;;  %1902 = vmatpush.bf16.msra.mxu3 %v3118_v48  ;;  %v2661_v48 = vld [vmem:[%s4535_s0 + $0x36c] sm:$0xf0] }
 0x121   :  { %v3882_v5 = vadd.f32 %v1542_v62, %v1454_v53  ;;  %1317 = vmatmul.bf16.gmra.mxu1 %v2572_v55  ;;  %1406 = vmatmul.bf16.gmra.mxu2 %v2576_v35  ;;  %v2631_v53 = vld [vmem:[%s4535_s0 + $0x318] sm:$0xf] }
 0x123   :  { %1495 = vmatmul.bf16.gmra.mxu3 %v2580_v63  ;;  %1584 = vmatmul.bf16.gmra.mxu0 %v2584_v4  ;;  %v3055_v4 = vld [vmem:[%s4535_s0 + $0x330] sm:$0xf0] }
 0x124   :  { %v1367_v6 = vpop.f32.mrf.mxu2  ;;  %v2632_v15 = vor.u32 %v3055_v4, %v2631_v53 }
 0x125   :  { %v1368_v17 = vadd.f32 %v1367_v6, %v1279_v3  ;;  %v2625_v3 = vld [vmem:[%s4535_s0 + $0x32c] sm:$0xf0]  ;;  %v2633_v6 = vld [vmem:[%s4535_s0 + $0x334] sm:$0xf0] }
 0x126   :  { %v1456_v8 = vpop.f32.mrf.mxu3  ;;  %v1280_v54 = vpop.f32.mrf.mxu1 }
 0x127   :  { %v1281_v11 = vadd.f32 %v1280_v54, %v3565_v34  ;;  %v3888_v13 = vadd.f32 %v1456_v8, %v1368_v17  ;;  %v3045_v34 = vld [vmem:[%s4535_s0 + $0x2e4] sm:$0xf]  ;;  %v2639_v8 = vld [vmem:[%s4535_s0 + $0x320] sm:$0xf] }
 0x128   :  { %v2608_v26 = vor.u32 %v3045_v34, %v2605_v28  ;;  %v2640_v28 = vor.u32 %v3056_v9, %v2639_v8 }
 0x12c   :  { %v1369_v31 = vpop.f32.mrf.mxu2 }
 0x12d   :  { %v3914_v38 = vadd.f32 %v1369_v31, %v1281_v11 }
 0x12e   :  { %v3916_v16 = vpop.f32.mrf.mxu3  ;;  %v1283_v42 = vpop.f32.mrf.mxu1 }
 0x12f   :  { %v1284_v43 = vadd.f32 %v1283_v42, %v3600_v52  ;;  %v3051_v52 = vld [vmem:[%s4535_s0 + $0x314] sm:$0xf] }
 0x130   :  { %v2628_v25 = vor.u32 %v3051_v52, %v2625_v3 }
 0x131   :  { %1322 = vmatmul.bf16.gmra.mxu1 %v2600_v2  ;;  %1411 = vmatmul.bf16.gmra.mxu2 %v2604_v40 }
 0x133   :  { %1500 = vmatmul.bf16.gmra.mxu3 %v2608_v26  ;;  %1589 = vmatmul.bf16.gmra.mxu0 %v2612_v46  ;;  %v3058_v26 = vld [vmem:[%s4535_s0 + $0x34c] sm:$0xf] }
 0x134   :  { %v1372_v61 = vpop.f32.mrf.mxu2  ;;  %v3062_v46 = vld [vmem:[%s4535_s0 + $0x368] sm:$0xf0] }
 0x135   :  { %v1373_v55 = vadd.f32 %v1372_v61, %v1284_v43  ;;  %v2659_v43 = vld [vmem:[%s4535_s0 + $0x350] sm:$0xf] }
 0x136   :  { %v1461_v35 = vpop.f32.mrf.mxu3  ;;  %v1285_v57 = vpop.f32.mrf.mxu1  ;;  %v2660_v3 = vor.u32 %v3062_v46, %v2659_v43 }
 0x137   :  { %v1286_v62 = vadd.f32 %v1285_v57, %v3611_v60  ;;  %v3923_v63 = vadd.f32 %v1461_v35, %v1373_v55  ;;  %v3052_v60 = vld [vmem:[%s4535_s0 + $0x31c] sm:$0xf]  ;;  %v2667_v55 = vld [vmem:[%s4535_s0 + $0x358] sm:$0xf]  ;;  %v3063_v35 = vld [vmem:[%s4535_s0 + $0x370] sm:$0xf0] }
 0x138   :  { %v2636_v21 = vor.u32 %v3052_v60, %v2633_v6  ;;  %v2668_v6 = vor.u32 %v3063_v35, %v2667_v55 }
 0x13c   :  { %v1374_v17 = vpop.f32.mrf.mxu2 }
 0x13d   :  { %v3949_v54 = vadd.f32 %v1374_v17, %v1286_v62  ;;  %v3117_v17 = vld [vmem:[%s4536_s3 + $0x18] sm:$0xff] }
 0x13e   :  { %v3951_v11 = vpop.f32.mrf.mxu3  ;;  %v1288_v20 = vpop.f32.mrf.mxu1  ;;  %1903 = vmatpush.bf16.msra.mxu3 %v3117_v17 }
 0x13f   :  { %v1289_v34 = vadd.f32 %v1288_v20, %v3646_v14  ;;  %v2653_v14 = vld [vmem:[%s4535_s0 + $0x364] sm:$0xf0] }
 0x140   :  { %v2656_v52 = vor.u32 %v3058_v26, %v2653_v14 }
 0x141   :  { %1327 = vmatmul.bf16.gmra.mxu1 %v2628_v25  ;;  %1416 = vmatmul.bf16.gmra.mxu2 %v2632_v15 }
 0x143   :  { %1505 = vmatmul.bf16.gmra.mxu3 %v2636_v21  ;;  %1594 = vmatmul.bf16.gmra.mxu0 %v2640_v28  ;;  %v2255_v28 = vld [vmem:[%s4535_s0 + $0x18] sm:$0xf] }
 0x144   :  { %v1377_v31 = vpop.f32.mrf.mxu2 }
 0x145   :  { %v1378_v32 = vadd.f32 %v1377_v31, %v1289_v34  ;;  %v2249_v34 = vld [vmem:[%s4535_s0 + $0x2c] sm:$0xf0]  ;;  %v2959_v31 = vld [vmem:[%s4535_s0 + $0x30] sm:$0xf0] }
 0x146   :  { %v1466_v37 = vpop.f32.mrf.mxu3  ;;  %v1290_v2 = vpop.f32.mrf.mxu1 }
 0x147   :  { %v1291_v40 = vadd.f32 %v1290_v2, %v3660_v24  ;;  %v3955_v42 = vadd.f32 %v1466_v37, %v1378_v32  ;;  %v3059_v24 = vld [vmem:[%s4535_s0 + $0x354] sm:$0xf] }
 0x148   :  { %v2664_v4 = vor.u32 %v3059_v24, %v2661_v48  ;;  %v3129_v48 = vld [vmem:[%s4537_s5 + $0x38] sm:$0xff] }
 0x149   :  { %2104 = vmatpush.bf16.msra.mxu0 %v3129_v48 }
 0x14c   :  { %v1379_v61 = vpop.f32.mrf.mxu2 }
 0x14d   :  { %v3981_v57 = vadd.f32 %v1379_v61, %v1291_v40  ;;  %v2256_v40 = vor.u32 %v2959_v31, %v2255_v28 }
 0x14e   :  { %v3983_v62 = vpop.f32.mrf.mxu3  ;;  %v1293_v53 = vpop.f32.mrf.mxu1 }
 0x14f   :  { %v1294_v60 = vadd.f32 %v1293_v53, %v3695_v49  ;;  %v2955_v49 = vld [vmem:[%s4535_s0 + $0x14] sm:$0xf]  ;;  %v2966_v53 = vld [vmem:[%s4535_s0 + $0x68] sm:$0xf0] }
 0x150   :  { %v2252_v2 = vor.u32 %v2955_v49, %v2249_v34 }
 0x151   :  { %1332 = vmatmul.bf16.gmra.mxu1 %v2656_v52  ;;  %1421 = vmatmul.bf16.gmra.mxu2 %v2660_v3  ;;  %v2277_v52 = vld [vmem:[%s4535_s0 + $0x64] sm:$0xf0]  ;;  %v2283_v3 = vld [vmem:[%s4535_s0 + $0x50] sm:$0xf] }
 0x152   :  { %v2284_v17 = vor.u32 %v2966_v53, %v2283_v3 }
 0x153   :  { %1510 = vmatmul.bf16.gmra.mxu3 %v2664_v4  ;;  %1599 = vmatmul.bf16.gmra.mxu0 %v2668_v6 }
 0x154   :  { %v1382_v8 = vpop.f32.mrf.mxu2 }
 0x155   :  { %v1383_v9 = vadd.f32 %v1382_v8, %v1294_v60 }
 0x156   :  { %v1471_v25 = vpop.f32.mrf.mxu3  ;;  %v1295_v15 = vpop.f32.mrf.mxu1 }
 0x157   :  { %v1296_v20 = vadd.f32 %v1295_v15, %v3709_v1  ;;  %v3990_v21 = vadd.f32 %v1471_v25, %v1383_v9  ;;  %v3116_v25 = vld [vmem:[%s4536_s3 + $0x10] sm:$0xff] }
 0x158   :  { %1904 = vmatpush.bf16.msra.mxu3 %v3116_v25 }
 0x15c   :  { %v1384_v32 = vpop.f32.mrf.mxu2 }
 0x15d   :  { %v4004_v1 = vadd.f32 %v1384_v32, %v1296_v20  ;;  %v2305_v32 = vld [vmem:[%s4535_s0 + $0x9c] sm:$0xf0] }
 0x15e   :  { %v4006_v37 = vpop.f32.mrf.mxu3  ;;  %v1298_v26 = vpop.f32.mrf.mxu1 }
 0x15f   :  { %v1299_v14 = vadd.f32 %v1298_v26, %v3556_v29  ;;  %v2962_v29 = vld [vmem:[%s4535_s0 + $0x4c] sm:$0xf] }
 0x160   :  { %v2280_v6 = vor.u32 %v2962_v29, %v2277_v52  ;;  %v3128_v52 = vld [vmem:[%s4537_s5 + $0x30] sm:$0xff] }
 0x161   :  { %1613 = vmatmul.bf16.vlgmr.msra.gmra.mxu1 %v2252_v2  ;;  %2873 = vmatmul.msk.bf16.vlgmr.msra.gmra.mxu2 %vm1111_vm0, %v2256_v40  ;;  %v2311_v2 = vld [vmem:[%s4535_s0 + $0x88] sm:$0xf]  ;;  %v2973_v40 = vld [vmem:[%s4535_s0 + $0xa0] sm:$0xf0] }
 0x162   :  { %2105 = vmatpush.bf16.msra.mxu0 %v3128_v52 }
 0x164   :  { %v1387_v43 = vpop.f32.mrf.mxu2 }
 0x165   :  { %v1388_v46 = vadd.f32 %v1387_v43, %v1299_v14 }
 0x166   :  { %v1476_v24 = vpop.f32.mrf.mxu3  ;;  %v1300_v61 = vpop.f32.mrf.mxu1 }
 0x167   :  { %v1301_v55 = vadd.f32 %v1300_v61, %v3594_v45  ;;  %v4014_v35 = vadd.f32 %v1476_v24, %v1388_v46  ;;  %v2312_v46 = vor.u32 %v2973_v40, %v2311_v2 }
 0x16c   :  { %v1389_v45 = vpop.f32.mrf.mxu2 }
 0x16d   :  { %v4028_v4 = vadd.f32 %v1389_v45, %v1301_v55 }
 0x16e   :  { %v4030_v60 = vpop.f32.mrf.mxu3  ;;  %v1303_v8 = vpop.f32.mrf.mxu1 }
 0x16f   :  { %v1304_v9 = vadd.f32 %v1303_v8, %v3605_v56  ;;  %v2969_v56 = vld [vmem:[%s4535_s0 + $0x84] sm:$0xf]  ;;  %v2980_v8 = vld [vmem:[%s4535_s0 + $0xd8] sm:$0xf0] }
 0x170   :  { %v2308_v43 = vor.u32 %v2969_v56, %v2305_v32 }
 0x171   :  { %1618 = vmatmul.bf16.gmra.mxu1 %v2280_v6  ;;  %2874 = vmatmul.msk.bf16.gmra.mxu2 %vm1111_vm0, %v2284_v17  ;;  %v2333_v6 = vld [vmem:[%s4535_s0 + $0xd4] sm:$0xf0]  ;;  %v2339_v17 = vld [vmem:[%s4535_s0 + $0xc0] sm:$0xf] }
 0x174   :  { %v1392_v15 = vpop.f32.mrf.mxu2 }
 0x175   :  { %v1393_v20 = vadd.f32 %v1392_v15, %v1304_v9 }
 0x176   :  { %v1481_v49 = vpop.f32.mrf.mxu3  ;;  %v1305_v34 = vpop.f32.mrf.mxu1 }
 0x177   :  { %v1306_v28 = vadd.f32 %v1305_v34, %v3640_v7  ;;  %v4038_v31 = vadd.f32 %v1481_v49, %v1393_v20  ;;  %v2340_v20 = vor.u32 %v2980_v8, %v2339_v17  ;;  %v3127_v8 = vld [vmem:[%s4537_s5 + $0x28] sm:$0xff] }
 0x178   :  { %2106 = vmatpush.bf16.msra.mxu0 %v3127_v8 }
 0x17c   :  { %v1394_v26 = vpop.f32.mrf.mxu2 }
 0x17d   :  { %v4052_v7 = vadd.f32 %v1394_v26, %v1306_v28  ;;  %v3115_v28 = vld [vmem:[%s4536_s3 + $0x8] sm:$0xff] }
 0x17e   :  { %v4054_v14 = vpop.f32.mrf.mxu3  ;;  %v1308_v24 = vpop.f32.mrf.mxu1  ;;  %1905 = vmatpush.bf16.msra.mxu3 %v3115_v28  ;;  %v2994_v28 = vld [vmem:[%s4535_s0 + $0x148] sm:$0xf0] }
 0x17f   :  { %v1309_v48 = vadd.f32 %v1308_v24, %v3651_v19  ;;  %v2976_v19 = vld [vmem:[%s4535_s0 + $0xbc] sm:$0xf]  ;;  %v2367_v24 = vld [vmem:[%s4535_s0 + $0xf8] sm:$0xf] }
 0x180   :  { %v2336_v15 = vor.u32 %v2976_v19, %v2333_v6 }
 0x181   :  { %1623 = vmatmul.bf16.gmra.mxu1 %v2308_v43  ;;  %2875 = vmatmul.msk.bf16.gmra.mxu2 %vm1111_vm0, %v2312_v46  ;;  %v2361_v46 = vld [vmem:[%s4535_s0 + $0x10c] sm:$0xf0] }
 0x184   :  { %v1397_v61 = vpop.f32.mrf.mxu2 }
 0x185   :  { %v1398_v55 = vadd.f32 %v1397_v61, %v1309_v48  ;;  %v2987_v48 = vld [vmem:[%s4535_s0 + $0x110] sm:$0xf0] }
 0x186   :  { %v1486_v29 = vpop.f32.mrf.mxu3  ;;  %v1310_v3 = vpop.f32.mrf.mxu1  ;;  %v2368_v52 = vor.u32 %v2987_v48, %v2367_v24 }
 0x187   :  { %v1311_v53 = vadd.f32 %v1310_v3, %v3689_v41  ;;  %v4062_v45 = vadd.f32 %v1486_v29, %v1398_v55 }
 0x18c   :  { %v1399_v41 = vpop.f32.mrf.mxu2 }
 0x18d   :  { %v4076_v9 = vadd.f32 %v1399_v41, %v1311_v53 }
 0x18e   :  { %v4078_v25 = vpop.f32.mrf.mxu3  ;;  %v1313_v49 = vpop.f32.mrf.mxu1 }
 0x18f   :  { %v1314_v34 = vadd.f32 %v1313_v49, %v3703_v58  ;;  %v2983_v58 = vld [vmem:[%s4535_s0 + $0xf4] sm:$0xf]  ;;  %v2389_v49 = vld [vmem:[%s4535_s0 + $0x144] sm:$0xf0] }
 0x190   :  { %v2364_v29 = vor.u32 %v2983_v58, %v2361_v46  ;;  %v3114_v46 = vld [vmem:[%s4536_s3] sm:$0xff] }
 0x191   :  { %1628 = vmatmul.bf16.gmra.mxu1 %v2336_v15  ;;  %2876 = vmatmul.msk.bf16.gmra.mxu2 %vm1111_vm0, %v2340_v20 }
 0x192   :  { %1906 = vmatpush.bf16.msra.mxu3 %v3114_v46  ;;  %v3004_v46 = vld [vmem:[%s4535_s0 + $0x19c] sm:$0xf] }
 0x194   :  { %v1402_v56 = vpop.f32.mrf.mxu2 }
 0x195   :  { %v1403_v32 = vadd.f32 %v1402_v56, %v1314_v34  ;;  %v2395_v34 = vld [vmem:[%s4535_s0 + $0x130] sm:$0xf] }
 0x196   :  { %v1491_v2 = vpop.f32.mrf.mxu3  ;;  %v1315_v40 = vpop.f32.mrf.mxu1 }
 0x197   :  { %v1316_v26 = vadd.f32 %v1315_v40, %v3740_v18  ;;  %v4086_v43 = vadd.f32 %v1491_v2, %v1403_v32  ;;  %v2396_v40 = vor.u32 %v2994_v28, %v2395_v34 }
 0x19c   :  { %v1404_v61 = vpop.f32.mrf.mxu2 }
 0x19d   :  { %v4100_v18 = vadd.f32 %v1404_v61, %v1316_v26 }
 0x19e   :  { %v4102_v55 = vpop.f32.mrf.mxu3  ;;  %v1318_v3 = vpop.f32.mrf.mxu1 }
 0x19f   :  { %v1319_v53 = vadd.f32 %v1318_v3, %v3562_v33  ;;  %v2990_v33 = vld [vmem:[%s4535_s0 + $0x12c] sm:$0xf] }
 0x1a0   :  { %v2392_v2 = vor.u32 %v2990_v33, %v2389_v49 }
 0x1a1   :  { %1633 = vmatmul.bf16.gmra.mxu1 %v2364_v29  ;;  %2877 = vmatmul.msk.bf16.gmra.mxu2 %vm1111_vm0, %v2368_v52 }
 0x1a4   :  { %v1407_v19 = vpop.f32.mrf.mxu2 }
 0x1a5   :  { %v1408_v6 = vadd.f32 %v1407_v19, %v1319_v53  ;;  %v2417_v53 = vld [vmem:[%s4535_s0 + $0x17c] sm:$0xf0]  ;;  %v2423_v19 = vld [vmem:[%s4535_s0 + $0x168] sm:$0xf] }
 0x1a6   :  { %v1496_v17 = vpop.f32.mrf.mxu3  ;;  %v1320_v41 = vpop.f32.mrf.mxu1 }
 0x1a7   :  { %v1321_v15 = vadd.f32 %v1320_v41, %v3597_v50  ;;  %v4110_v20 = vadd.f32 %v1496_v17, %v1408_v6  ;;  %v3001_v6 = vld [vmem:[%s4535_s0 + $0x180] sm:$0xf0] }
 0x1ac   :  { %v1409_v50 = vpop.f32.mrf.mxu2 }
 0x1ad   :  { %v4124_v56 = vadd.f32 %v1409_v50, %v1321_v15  ;;  %v2424_v15 = vor.u32 %v3001_v6, %v2423_v19 }
 0x1ae   :  { %v4126_v32 = vpop.f32.mrf.mxu3  ;;  %v1323_v26 = vpop.f32.mrf.mxu1 }
 0x1af   :  { %v1324_v58 = vadd.f32 %v1323_v26, %v3608_v59  ;;  %v2997_v59 = vld [vmem:[%s4535_s0 + $0x164] sm:$0xf] }
 0x1b0   :  { %v2420_v41 = vor.u32 %v2997_v59, %v2417_v53 }
 0x1b1   :  { %1638 = vmatmul.bf16.gmra.mxu1 %v2392_v2  ;;  %2878 = vmatmul.msk.bf16.gmra.mxu2 %vm1111_vm0, %v2396_v40 }
 0x1b4   :  { %v1412_v24 = vpop.f32.mrf.mxu2 }
 0x1b5   :  { %v1413_v48 = vadd.f32 %v1412_v24, %v1324_v58  ;;  %v3126_v58 = vld [vmem:[%s4537_s5 + $0x20] sm:$0xff] }
 0x1b6   :  { %v1501_v61 = vpop.f32.mrf.mxu3  ;;  %v1325_v29 = vpop.f32.mrf.mxu1  ;;  %2107 = vmatpush.bf16.msra.mxu0 %v3126_v58  ;;  %v2451_v24 = vld [vmem:[%s4535_s0 + $0x1a0] sm:$0xf] }
 0x1b7   :  { %v1326_v52 = vadd.f32 %v1325_v29, %v3643_v12  ;;  %v4134_v3 = vadd.f32 %v1501_v61, %v1413_v48 }
 0x1bc   :  { %v1414_v17 = vpop.f32.mrf.mxu2 }
 0x1bd   :  { %v4148_v12 = vadd.f32 %v1414_v17, %v1326_v52 }
 0x1be   :  { %v4150_v8 = vpop.f32.mrf.mxu3  ;;  %v1328_v33 = vpop.f32.mrf.mxu1 }
 0x1bf   :  { %v1329_v49 = vadd.f32 %v1328_v33, %v3657_v23  ;;  %v2445_v23 = vld [vmem:[%s4535_s0 + $0x1b4] sm:$0xf0] }
 0x1c0   :  { %v2448_v52 = vor.u32 %v3004_v46, %v2445_v23 }
 0x1c1   :  { %1643 = vmatmul.bf16.gmra.mxu1 %v2420_v41  ;;  %2879 = vmatmul.msk.bf16.gmra.mxu2 %vm1111_vm0, %v2424_v15 }
 0x1c4   :  { %v1417_v34 = vpop.f32.mrf.mxu2 }
 0x1c5   :  { %v1418_v28 = vadd.f32 %v1417_v34, %v1329_v49  ;;  %v3011_v34 = vld [vmem:[%s4535_s0 + $0x1d4] sm:$0xf] }
 0x1c6   :  { %v1506_v50 = vpop.f32.mrf.mxu3  ;;  %v1330_v2 = vpop.f32.mrf.mxu1 }
 0x1c7   :  { %v1331_v40 = vadd.f32 %v1330_v2, %v3692_v47  ;;  %v4155_v26 = vadd.f32 %v1506_v50, %v1418_v28  ;;  %v3008_v47 = vld [vmem:[%s4535_s0 + $0x1b8] sm:$0xf0]  ;;  %v2473_v28 = vld [vmem:[%s4535_s0 + $0x1ec] sm:$0xf0]  ;;  %v3015_v50 = vld [vmem:[%s4535_s0 + $0x1f0] sm:$0xf0] }
 0x1c8   :  { %v2452_v59 = vor.u32 %v3008_v47, %v2451_v24  ;;  %v3125_v47 = vld [vmem:[%s4537_s5 + $0x18] sm:$0xff] }
 0x1c9   :  { %2108 = vmatpush.bf16.msra.mxu0 %v3125_v47  ;;  %v2535_v47 = vld [vmem:[%s4535_s0 + $0x248] sm:$0xf] }
 0x1cc   :  { %v1419_v48 = vpop.f32.mrf.mxu2 }
 0x1cd   :  { %v4172_v61 = vadd.f32 %v1419_v48, %v1331_v40  ;;  %v2476_v40 = vor.u32 %v3011_v34, %v2473_v28  ;;  %v4213_v28 = vpop.f32.mrf.mxu0 }
 0x1ce   :  { %v4174_v29 = vpop.f32.mrf.mxu3  ;;  %v1333_v53 = vpop.f32.mrf.mxu1 }
 0x1cf   :  { %v1334_v19 = vadd.f32 %v1333_v53, %v3706_v0  ;;  %v2479_v0 = vld [vmem:[%s4535_s0 + $0x1d8] sm:$0xf]  ;;  %v2507_v53 = vld [vmem:[%s4535_s0 + $0x210] sm:$0xf] }
 0x1d0   :  { %v2480_v58 = vor.u32 %v3015_v50, %v2479_v0 }
 0x1d1   :  { %1648 = vmatmul.bf16.gmra.mxu1 %v2448_v52  ;;  %2880 = vmatmul.msk.bf16.gmra.mxu2 %vm1111_vm0, %v2452_v59  ;;  %v3018_v52 = vld [vmem:[%s4535_s0 + $0x20c] sm:$0xf]  ;;  %v2501_v59 = vld [vmem:[%s4535_s0 + $0x224] sm:$0xf0] }
 0x1d4   :  { %v1422_v6 = vpop.f32.mrf.mxu2 }
 0x1d5   :  { %v1423_v17 = vadd.f32 %v1422_v6, %v1334_v19  ;;  %v3022_v19 = vld [vmem:[%s4535_s0 + $0x228] sm:$0xf0] }
 0x1d6   :  { %v1511_v41 = vpop.f32.mrf.mxu3  ;;  %v1335_v15 = vpop.f32.mrf.mxu1 }
 0x1d7   :  { %v1336_v33 = vadd.f32 %v1335_v15, %v3743_v22  ;;  %v4179_v49 = vadd.f32 %v1511_v41, %v1423_v17  ;;  %v2504_v15 = vor.u32 %v3018_v52, %v2501_v59 }
 0x1dc   :  { %v1424_v2 = vpop.f32.mrf.mxu2 }
 0x1dd   :  { %v4193_v22 = vadd.f32 %v1424_v2, %v1336_v33  ;;  %v2508_v33 = vor.u32 %v3022_v19, %v2507_v53 }
 0x1de   :  { %v1614_v46 = vpop.f32.mrf.mxu1 }
 0x1df   :  { %v1615_v48 = vadd.f32 %v1614_v46, %v3750_v51  ;;  %v4216_v46 = vpop.f32.mrf.mxu0 }
 0x1e1   :  { %1653 = vmatmul.bf16.gmra.mxu1 %v2476_v40  ;;  %2881 = vmatmul.msk.bf16.gmra.mxu2 %vm1111_vm0, %v2480_v58 }
 0x1e4   :  { %v1703_v23 = vpop.f32.mrf.mxu2 }
 0x1e5   :  { %v1704_v6 = vadd.f32 %v1703_v23, %v1615_v48  ;;  %v3025_v23 = vld [vmem:[%s4535_s0 + $0x244] sm:$0xf] }
 0x1e6   :  { %v1616_v24 = vpop.f32.mrf.mxu1  ;;  %v3029_v48 = vld [vmem:[%s4535_s0 + $0x260] sm:$0xf0] }
 0x1e7   :  { %v1617_v51 = vadd.f32 %v1616_v24, %v3778_v30  ;;  %v1783_v0 = vmax.f32 %v1704_v6, 0.0  ;;  %v2529_v24 = vld [vmem:[%s4535_s0 + $0x25c] sm:$0xf0]  ;;  %v2536_v6 = vor.u32 %v3029_v48, %v2535_v47 }
 0x1e8   :  { %v2532_v19 = vor.u32 %v3025_v23, %v2529_v24 }
 0x1ec   :  { %v1705_v17 = vpop.f32.mrf.mxu2 }
 0x1ed   :  { %v1706_v41 = vadd.f32 %v1705_v17, %v1617_v51 }
 0x1ee   :  { %v1619_v34 = vpop.f32.mrf.mxu1 }
 0x1ef   :  { %v1784_v50 = vmax.f32 %v1706_v41, 0.0  ;;  %v1620_v30 = vadd.f32 %v1619_v34, %v3785_v44 }
 0x1f1   :  { %v1815_v2 = vpack.c.bf16 %v1784_v50, %v1783_v0  ;;  %1658 = vmatmul.bf16.gmra.mxu1 %v2504_v15  ;;  %2882 = vmatmul.msk.bf16.gmra.mxu2 %vm1111_vm0, %v2508_v33  ;;  %v4233_v33 = vpop.f32.mrf.mxu0 }
 0x1f3   :  { %1907 = vmatmul.bf16.vlgmr.msra.gmra.mxu3 %v1815_v2  ;;  %v3032_v2 = vld [vmem:[%s4535_s0 + $0x27c] sm:$0xf] }
 0x1f4   :  { %v1708_v40 = vpop.f32.mrf.mxu2 }
 0x1f5   :  { %v1709_v52 = vadd.f32 %v1708_v40, %v1620_v30  ;;  %v2557_v40 = vld [vmem:[%s4535_s0 + $0x294] sm:$0xf0]  ;;  %v3036_v30 = vld [vmem:[%s4535_s0 + $0x298] sm:$0xf0] }
 0x1f6   :  { %v1621_v58 = vpop.f32.mrf.mxu1 }
 0x1f7   :  { %v1622_v59 = vadd.f32 %v1621_v58, %v3813_v27  ;;  %v1785_v17 = vmax.f32 %v1709_v52, 0.0  ;;  %v3124_v27 = vld [vmem:[%s4537_s5 + $0x10] sm:$0xff]  ;;  %v2563_v58 = vld [vmem:[%s4535_s0 + $0x280] sm:$0xf]  ;;  %v2560_v52 = vor.u32 %v3032_v2, %v2557_v40 }
 0x1f8   :  { %2109 = vmatpush.bf16.msra.mxu0 %v3124_v27  ;;  %v3043_v27 = vld [vmem:[%s4535_s0 + $0x2d0] sm:$0xf0] }
 0x1f9   :  { %v4252_v47 = vpop.f32.mrf.mxu0 }
 0x1fc   :  { %v1710_v44 = vpop.f32.mrf.mxu2 }
 0x1fd   :  { %v1711_v53 = vadd.f32 %v1710_v44, %v1622_v59  ;;  %v2564_v59 = vor.u32 %v3036_v30, %v2563_v58 }
 0x1fe   :  { %v1624_v51 = vpop.f32.mrf.mxu1 }
 0x1ff   :  { %v1786_v41 = vmax.f32 %v1711_v53, 0.0  ;;  %v1625_v50 = vadd.f32 %v1624_v51, %v3820_v39 }
 0x201   :  { %1663 = vmatmul.bf16.gmra.mxu1 %v2532_v19  ;;  %2883 = vmatmul.msk.bf16.gmra.mxu2 %vm1111_vm0, %v2536_v6  ;;  %v1816_v15 = vpack.c.bf16 %v1786_v41, %v1785_v17  ;;  %v4255_v41 = vpop.f32.mrf.mxu0 }
 0x203   :  { %1912 = vmatmul.bf16.gmra.mxu3 %v1816_v15  ;;  %v3039_v15 = vld [vmem:[%s4535_s0 + $0x2b4] sm:$0xf] }
 0x204   :  { %v1713_v34 = vpop.f32.mrf.mxu2 }
 0x205   :  { %v1714_v23 = vadd.f32 %v1713_v34, %v1625_v50  ;;  %v2585_v34 = vld [vmem:[%s4535_s0 + $0x2cc] sm:$0xf0] }
 0x206   :  { %v1626_v0 = vpop.f32.mrf.mxu1  ;;  %v2588_v58 = vor.u32 %v3039_v15, %v2585_v34 }
 0x207   :  { %v1627_v39 = vadd.f32 %v1626_v0, %v3848_v10  ;;  %v1787_v53 = vmax.f32 %v1714_v23, 0.0  ;;  %v2591_v0 = vld [vmem:[%s4535_s0 + $0x2b8] sm:$0xf] }
 0x208   :  { %v2592_v30 = vor.u32 %v3043_v27, %v2591_v0 }
 0x20c   :  { %v1715_v24 = vpop.f32.mrf.mxu2 }
 0x20d   :  { %v1716_v48 = vadd.f32 %v1715_v24, %v1627_v39 }
 0x20e   :  { %v1629_v44 = vpop.f32.mrf.mxu1 }
 0x20f   :  { %v1788_v19 = vmax.f32 %v1716_v48, 0.0  ;;  %v1630_v10 = vadd.f32 %v1629_v44, %v3855_v36  ;;  %v1557_v48 = vpop.f32.mrf.mxu0  ;;  %v1459_v44 = vadd.f32 %v3916_v16, %v3914_v38  ;;  %v2613_v38 = vld [vmem:[%s4535_s0 + $0x304] sm:$0xf0]  ;;  %v3050_v16 = vld [vmem:[%s4535_s0 + $0x308] sm:$0xf0] }
 0x211   :  { %1668 = vmatmul.bf16.gmra.mxu1 %v2560_v52  ;;  %2884 = vmatmul.msk.bf16.gmra.mxu2 %vm1111_vm0, %v2564_v59  ;;  %v1817_v6 = vpack.c.bf16 %v1788_v19, %v1787_v53  ;;  %v3123_v19 = vld [vmem:[%s4537_s5 + $0x8] sm:$0xff] }
 0x212   :  { %2110 = vmatpush.bf16.msra.mxu0 %v3123_v19 }
 0x213   :  { %1917 = vmatmul.bf16.gmra.mxu3 %v1817_v6  ;;  %v1548_v6 = vadd.f32 %v4216_v46, %v1459_v44  ;;  %v3053_v44 = vld [vmem:[%s4535_s0 + $0x324] sm:$0xf] }
 0x214   :  { %v1718_v51 = vpop.f32.mrf.mxu2 }
 0x215   :  { %v1719_v50 = vadd.f32 %v1718_v51, %v1630_v10 }
 0x216   :  { %v1631_v17 = vpop.f32.mrf.mxu1 }
 0x217   :  { %v1632_v2 = vadd.f32 %v1631_v17, %v3882_v5  ;;  %v1789_v39 = vmax.f32 %v1719_v50, 0.0  ;;  %v1546_v5 = vadd.f32 %v4213_v28, %v3888_v13  ;;  %v3046_v17 = vld [vmem:[%s4535_s0 + $0x2ec] sm:$0xf]  ;;  %v2619_v13 = vld [vmem:[%s4535_s0 + $0x2f0] sm:$0xf]  ;;  %v4292_v28 = vpop.f32.mrf.mxu0 }
 0x218   :  { %v2616_v0 = vor.u32 %v3046_v17, %v2613_v38  ;;  %v2620_v27 = vor.u32 %v3050_v16, %v2619_v13 }
 0x21c   :  { %v1720_v36 = vpop.f32.mrf.mxu2 }
 0x21d   :  { %v1721_v40 = vadd.f32 %v1720_v36, %v1632_v2 }
 0x21e   :  { %v1634_v23 = vpop.f32.mrf.mxu1 }
 0x21f   :  { %v1790_v24 = vmax.f32 %v1721_v40, 0.0  ;;  %v1635_v51 = vadd.f32 %v1634_v23, %v1546_v5  ;;  %v1562_v23 = vpop.f32.mrf.mxu0 }
 0x221   :  { %1673 = vmatmul.bf16.gmra.mxu1 %v2588_v58  ;;  %2885 = vmatmul.msk.bf16.gmra.mxu2 %vm1111_vm0, %v2592_v30  ;;  %v1818_v52 = vpack.c.bf16 %v1790_v24, %v1789_v39  ;;  %v1464_v30 = vadd.f32 %v3951_v11, %v3949_v54  ;;  %v1551_v24 = vadd.f32 %v4233_v33, %v3923_v63  ;;  %v2647_v54 = vld [vmem:[%s4535_s0 + $0x328] sm:$0xf]  ;;  %v3057_v11 = vld [vmem:[%s4535_s0 + $0x340] sm:$0xf0] }
 0x223   :  { %1922 = vmatmul.bf16.gmra.mxu3 %v1818_v52  ;;  %v1553_v52 = vadd.f32 %v4252_v47, %v1464_v30 }
 0x224   :  { %v1723_v59 = vpop.f32.mrf.mxu2 }
 0x225   :  { %v1724_v46 = vadd.f32 %v1723_v59, %v1635_v51 }
 0x226   :  { %v1636_v53 = vpop.f32.mrf.mxu1 }
 0x227   :  { %v1637_v10 = vadd.f32 %v1636_v53, %v1548_v6  ;;  %v1791_v2 = vmax.f32 %v1724_v46, 0.0  ;;  %v2641_v53 = vld [vmem:[%s4535_s0 + $0x33c] sm:$0xf0]  ;;  %v2648_v6 = vor.u32 %v3057_v11, %v2647_v54  ;;  %v1565_v17 = vpop.f32.mrf.mxu0  ;;  %v1474_v11 = vadd.f32 %v4006_v37, %v4004_v1 }
 0x228   :  { %v2644_v19 = vor.u32 %v3053_v44, %v2641_v53  ;;  %v1479_v1 = vadd.f32 %v4030_v60, %v4028_v4  ;;  %v1484_v4 = vadd.f32 %v4054_v14, %v4052_v7 }
 0x22c   :  { %v1725_v15 = vpop.f32.mrf.mxu2 }
 0x22d   :  { %v1726_v34 = vadd.f32 %v1725_v15, %v1637_v10  ;;  %v1469_v10 = vadd.f32 %v3983_v62, %v3981_v57  ;;  %v2669_v57 = vld [vmem:[%s4535_s0 + $0x374] sm:$0xf0]  ;;  %v3064_v62 = vld [vmem:[%s4535_s0 + $0x378] sm:$0xf0] }
 0x22e   :  { %v1639_v50 = vpop.f32.mrf.mxu1 }
 0x22f   :  { %v1792_v36 = vmax.f32 %v1726_v34, 0.0  ;;  %v1640_v59 = vadd.f32 %v1639_v50, %v1551_v24  ;;  %v1556_v34 = vadd.f32 %v4255_v41, %v3955_v42  ;;  %v1567_v50 = vpop.f32.mrf.mxu0  ;;  %v2675_v42 = vld [vmem:[%s4535_s0 + $0x360] sm:$0xf] }
 0x231   :  { %v1819_v40 = vpack.c.bf16 %v1792_v36, %v1791_v2  ;;  %1678 = vmatmul.bf16.gmra.mxu1 %v2616_v0  ;;  %2886 = vmatmul.msk.bf16.gmra.mxu2 %vm1111_vm0, %v2620_v27  ;;  %v3122_v0 = vld [vmem:[%s4537_s5] sm:$0xff]  ;;  %v1558_v27 = vadd.f32 %v1557_v48, %v1469_v10  ;;  %v3060_v36 = vld [vmem:[%s4535_s0 + $0x35c] sm:$0xf] }
 0x232   :  { %2111 = vmatpush.bf16.msra.mxu0 %v3122_v0  ;;  %v2672_v30 = vor.u32 %v3060_v36, %v2669_v57  ;;  %v1566_v0 = vadd.f32 %v1565_v17, %v4014_v35 }
 0x233   :  { %1927 = vmatmul.bf16.gmra.mxu3 %v1819_v40 }
 0x234   :  { %v1728_v58 = vpop.f32.mrf.mxu2 }
 0x235   :  { %v1729_v63 = vadd.f32 %v1728_v58, %v1640_v59 }
 0x236   :  { %v1641_v39 = vpop.f32.mrf.mxu1 }
 0x237   :  { %v1642_v33 = vadd.f32 %v1641_v39, %v1553_v52  ;;  %v1793_v38 = vmax.f32 %v1729_v63, 0.0  ;;  %v2676_v39 = vor.u32 %v3064_v62, %v2675_v42  ;;  %v1570_v53 = vpop.f32.mrf.mxu0  ;;  %v4340_v42 = vpop.f32.mrf.mxu3 }
 0x238   :  { %v1571_v17 = vadd.f32 %v1570_v53, %v4038_v31 }
 0x23c   :  { %v1730_v47 = vpop.f32.mrf.mxu2 }
 0x23d   :  { %v1731_v5 = vadd.f32 %v1730_v47, %v1642_v33  ;;  %v1561_v33 = vadd.f32 %v4292_v28, %v3990_v21  ;;  %v1563_v47 = vadd.f32 %v1562_v23, %v1474_v11  ;;  %v1568_v28 = vadd.f32 %v1567_v50, %v1479_v1 }
 0x23e   :  { %v1644_v51 = vpop.f32.mrf.mxu1 }
 0x23f   :  { %v1794_v13 = vmax.f32 %v1731_v5, 0.0  ;;  %v1645_v2 = vadd.f32 %v1644_v51, %v1556_v34 }
 0x241   :  { %v1820_v16 = vpack.c.bf16 %v1794_v13, %v1793_v38  ;;  %1683 = vmatmul.bf16.gmra.mxu1 %v2644_v19  ;;  %2887 = vmatmul.msk.bf16.gmra.mxu2 %vm1111_vm0, %v2648_v6  ;;  %v1572_v38 = vpop.f32.mrf.mxu0 }
 0x242   :  { %v1573_v50 = vadd.f32 %v1572_v38, %v1484_v4  ;;  %v1489_v38 = vadd.f32 %v4078_v25, %v4076_v9 }
 0x243   :  { %1932 = vmatmul.bf16.gmra.mxu3 %v1820_v16 }
 0x244   :  { %v1733_v46 = vpop.f32.mrf.mxu2 }
 0x245   :  { %v1734_v41 = vadd.f32 %v1733_v46, %v1645_v2 }
 0x246   :  { %v1646_v15 = vpop.f32.mrf.mxu1 }
 0x247   :  { %v1647_v48 = vadd.f32 %v1646_v15, %v1558_v27  ;;  %v1795_v52 = vmax.f32 %v1734_v41, 0.0 }
 0x249   :  { %v1575_v21 = vpop.f32.mrf.mxu0 }
 0x24c   :  { %v1735_v40 = vpop.f32.mrf.mxu2 }
 0x24d   :  { %v1736_v58 = vadd.f32 %v1735_v40, %v1647_v48 }
 0x24e   :  { %v1649_v24 = vpop.f32.mrf.mxu1 }
 0x24f   :  { %v1796_v59 = vmax.f32 %v1736_v58, 0.0  ;;  %v1650_v5 = vadd.f32 %v1649_v24, %v1561_v33  ;;  %v4348_v24 = vld [vmem:[%s4538_s4] ss:$0 sm:$0xff] }
 0x251   :  { %v1821_v44 = vpack.c.bf16 %v1796_v59, %v1795_v52  ;;  %1688 = vmatmul.bf16.gmra.mxu1 %v2672_v30  ;;  %2888 = vmatmul.msk.bf16.gmra.mxu2 %vm1111_vm0, %v2676_v39  ;;  %v1577_v40 = vpop.f32.mrf.mxu0 }
 0x253   :  { %1937 = vmatmul.bf16.gmra.mxu3 %v1821_v44 }
 0x254   :  { %v1738_v54 = vpop.f32.mrf.mxu2 }
 0x255   :  { %v1739_v19 = vadd.f32 %v1738_v54, %v1650_v5 }
 0x256   :  { %v1651_v63 = vpop.f32.mrf.mxu1 }
 0x257   :  { %v1652_v6 = vadd.f32 %v1651_v63, %v1563_v47  ;;  %v1797_v46 = vmax.f32 %v1739_v19, 0.0 }
 0x259   :  { %v1580_v52 = vpop.f32.mrf.mxu0 }
 0x25a   :  { %v1581_v4 = vadd.f32 %v1580_v52, %v4086_v43 }
 0x25c   :  { %v1740_v51 = vpop.f32.mrf.mxu2 }
 0x25d   :  { %v1741_v13 = vadd.f32 %v1740_v51, %v1652_v6 }
 0x25e   :  { %v1654_v16 = vpop.f32.mrf.mxu1 }
 0x25f   :  { %v1798_v10 = vmax.f32 %v1741_v13, 0.0  ;;  %v1655_v23 = vadd.f32 %v1654_v16, %v1566_v0 }
 0x261   :  { %v1822_v15 = vpack.c.bf16 %v1798_v10, %v1797_v46  ;;  %v1582_v13 = vpop.f32.mrf.mxu0  ;;  %v1576_v10 = vadd.f32 %v1575_v21, %v4062_v45 }
 0x263   :  { %1942 = vmatmul.bf16.gmra.mxu3 %v1822_v15  ;;  %v1578_v15 = vadd.f32 %v1577_v40, %v1489_v38  ;;  %v1494_v40 = vadd.f32 %v4102_v55, %v4100_v18 }
 0x264   :  { %v1743_v34 = vpop.f32.mrf.mxu2 }
 0x265   :  { %v1744_v27 = vadd.f32 %v1743_v34, %v1655_v23 }
 0x266   :  { %v1656_v37 = vpop.f32.mrf.mxu1 }
 0x267   :  { %v1657_v2 = vadd.f32 %v1656_v37, %v1568_v28  ;;  %v1799_v41 = vmax.f32 %v1744_v27, 0.0 }
 0x26c   :  { %v1745_v36 = vpop.f32.mrf.mxu2 }
 0x26d   :  { %v1746_v57 = vadd.f32 %v1745_v36, %v1657_v2  ;;  %v1585_v36 = vpop.f32.mrf.mxu0 }
 0x26e   :  { %v1659_v62 = vpop.f32.mrf.mxu1 }
 0x26f   :  { %v1800_v48 = vmax.f32 %v1746_v57, 0.0  ;;  %v1660_v39 = vadd.f32 %v1659_v62, %v1571_v17 }
 0x271   :  { %v1823_v58 = vpack.c.bf16 %v1800_v48, %v1799_v41 }
 0x273   :  { %1947 = vmatmul.bf16.gmra.mxu3 %v1823_v58 }
 0x274   :  { %v1748_v30 = vpop.f32.mrf.mxu2 }
 0x275   :  { %v1749_v59 = vadd.f32 %v1748_v30, %v1660_v39 }
 0x276   :  { %v1661_v35 = vpop.f32.mrf.mxu1  ;;  %v1908_v60 = vpop.f32.mrf.mxu3 }
 0x277   :  { %v1662_v44 = vadd.f32 %v1661_v35, %v1573_v50  ;;  %v1909_v11 = vadd.f32 %v4348_v24, %v1908_v60  ;;  %v1801_v14 = vmax.f32 %v1749_v59, 0.0  ;;  %v1583_v35 = vadd.f32 %v1582_v13, %v1494_v40  ;;  %v1587_v60 = vpop.f32.mrf.mxu0 }
 0x279   :  { %v1988_v53 = vmax.f32 %v1909_v11, 0.0 }
 0x27c   :  { %v1750_v54 = vpop.f32.mrf.mxu2 }
 0x27d   :  { %v1751_v63 = vadd.f32 %v1750_v54, %v1662_v44 }
 0x27e   :  { %v1664_v33 = vpop.f32.mrf.mxu1  ;;  %v1910_v7 = vpop.f32.mrf.mxu3 }
 0x27f   :  { %v1802_v47 = vmax.f32 %v1751_v63, 0.0  ;;  %v1911_v31 = vadd.f32 %v4348_v24, %v1910_v7  ;;  %v1665_v34 = vadd.f32 %v1664_v33, %v1576_v10 }
 0x281   :  { %v1824_v5 = vpack.c.bf16 %v1802_v47, %v1801_v14  ;;  %v1989_v19 = vmax.f32 %v1911_v31, 0.0  ;;  %v1590_v31 = vpop.f32.mrf.mxu0 }
 0x283   :  { %v2020_v6 = vpack.c.bf16 %v1989_v19, %v1988_v53  ;;  %1952 = vmatmul.bf16.gmra.mxu3 %v1824_v5  ;;  %v1499_v53 = vadd.f32 %v4126_v32, %v4124_v56 }
 0x284   :  { %v1753_v51 = vpop.f32.mrf.mxu2 }
 0x285   :  { %2112 = vmatmul.bf16.vlgmr.msra.gmra.mxu0 %v2020_v6  ;;  %v1754_v1 = vadd.f32 %v1753_v51, %v1665_v34  ;;  %v1586_v6 = vadd.f32 %v1585_v36, %v4110_v20  ;;  %v1588_v51 = vadd.f32 %v1587_v60, %v1499_v53  ;;  %v1504_v36 = vadd.f32 %v4150_v8, %v4148_v12 }
 0x286   :  { %v1666_v16 = vpop.f32.mrf.mxu1  ;;  %v1913_v46 = vpop.f32.mrf.mxu3 }
 0x287   :  { %v1667_v37 = vadd.f32 %v1666_v16, %v1578_v15  ;;  %v1914_v28 = vadd.f32 %v4348_v24, %v1913_v46  ;;  %v1803_v57 = vmax.f32 %v1754_v1, 0.0 }
 0x289   :  { %v1990_v25 = vmax.f32 %v1914_v28, 0.0  ;;  %v1592_v10 = vpop.f32.mrf.mxu0 }
 0x28c   :  { %v1755_v0 = vpop.f32.mrf.mxu2 }
 0x28d   :  { %v1756_v23 = vadd.f32 %v1755_v0, %v1667_v37 }
 0x28e   :  { %v1669_v27 = vpop.f32.mrf.mxu1  ;;  %v1915_v2 = vpop.f32.mrf.mxu3 }
 0x28f   :  { %v1804_v62 = vmax.f32 %v1756_v23, 0.0  ;;  %v1916_v9 = vadd.f32 %v4348_v24, %v1915_v2  ;;  %v1670_v17 = vadd.f32 %v1669_v27, %v1581_v4 }
 0x291   :  { %v1825_v41 = vpack.c.bf16 %v1804_v62, %v1803_v57  ;;  %v1991_v48 = vmax.f32 %v1916_v9, 0.0  ;;  %v1591_v9 = vadd.f32 %v1590_v31, %v4134_v3 }
 0x293   :  { %1957 = vmatmul.bf16.gmra.mxu3 %v1825_v41  ;;  %v2021_v45 = vpack.c.bf16 %v1991_v48, %v1990_v25  ;;  %v1595_v25 = vpop.f32.mrf.mxu0  ;;  %v1593_v41 = vadd.f32 %v1592_v10, %v1504_v36 }
 0x294   :  { %v1758_v21 = vpop.f32.mrf.mxu2 }
 0x295   :  { %2117 = vmatmul.bf16.gmra.mxu0 %v2021_v45  ;;  %v1759_v50 = vadd.f32 %v1758_v21, %v1670_v17 }
 0x296   :  { %v1671_v58 = vpop.f32.mrf.mxu1  ;;  %v1918_v30 = vpop.f32.mrf.mxu3 }
 0x297   :  { %v1672_v39 = vadd.f32 %v1671_v58, %v1583_v35  ;;  %v1919_v44 = vadd.f32 %v4348_v24, %v1918_v30  ;;  %v1805_v33 = vmax.f32 %v1759_v50, 0.0 }
 0x299   :  { %v1992_v55 = vmax.f32 %v1919_v44, 0.0 }
 0x29c   :  { %v1760_v59 = vpop.f32.mrf.mxu2 }
 0x29d   :  { %v1761_v54 = vadd.f32 %v1760_v59, %v1672_v39  ;;  %v1597_v59 = vpop.f32.mrf.mxu0 }
 0x29e   :  { %v1674_v11 = vpop.f32.mrf.mxu1  ;;  %v1920_v63 = vpop.f32.mrf.mxu3 }
 0x29f   :  { %v1806_v7 = vmax.f32 %v1761_v54, 0.0  ;;  %v1921_v18 = vadd.f32 %v4348_v24, %v1920_v63  ;;  %v1675_v38 = vadd.f32 %v1674_v11, %v1586_v6  ;;  %v1509_v54 = vadd.f32 %v4174_v29, %v4172_v61 }
 0x2a1   :  { %v1826_v14 = vpack.c.bf16 %v1806_v7, %v1805_v33  ;;  %v1993_v47 = vmax.f32 %v1921_v18, 0.0  ;;  %v1596_v33 = vadd.f32 %v1595_v25, %v4155_v26  ;;  %v1598_v7 = vadd.f32 %v1597_v59, %v1509_v54 }
 0x2a3   :  { %1962 = vmatmul.bf16.gmra.mxu3 %v1826_v14  ;;  %v2022_v43 = vpack.c.bf16 %v1993_v47, %v1992_v55 }
 0x2a4   :  { %v1763_v52 = vpop.f32.mrf.mxu2 }
 0x2a5   :  { %2122 = vmatmul.bf16.gmra.mxu0 %v2022_v43  ;;  %v1764_v13 = vadd.f32 %v1763_v52, %v1675_v38  ;;  %v1600_v47 = vpop.f32.mrf.mxu0 }
 0x2a6   :  { %v1676_v5 = vpop.f32.mrf.mxu1  ;;  %v1923_v19 = vpop.f32.mrf.mxu3 }
 0x2a7   :  { %v1677_v16 = vadd.f32 %v1676_v5, %v1588_v51  ;;  %v1924_v15 = vadd.f32 %v4348_v24, %v1923_v19  ;;  %v1807_v0 = vmax.f32 %v1764_v13, 0.0 }
 0x2a9   :  { %v1994_v32 = vmax.f32 %v1924_v15, 0.0  ;;  %v1601_v15 = vadd.f32 %v1600_v47, %v4179_v49 }
 0x2ac   :  { %v1765_v46 = vpop.f32.mrf.mxu2 }
 0x2ad   :  { %v1766_v34 = vadd.f32 %v1765_v46, %v1677_v16  ;;  %v1514_v16 = vadd.f32 %v4340_v42, %v4193_v22  ;;  %v1602_v46 = vpop.f32.mrf.mxu0 }
 0x2ae   :  { %v1679_v1 = vpop.f32.mrf.mxu1  ;;  %v1925_v37 = vpop.f32.mrf.mxu3 }
 0x2af   :  { %v1808_v28 = vmax.f32 %v1766_v34, 0.0  ;;  %v1926_v56 = vadd.f32 %v4348_v24, %v1925_v37  ;;  %v1680_v48 = vadd.f32 %v1679_v1, %v1591_v9  ;;  %v1603_v1 = vadd.f32 %v1602_v46, %v1514_v16 }
 0x2b1   :  { %v1827_v23 = vpack.c.bf16 %v1808_v28, %v1807_v0  ;;  %v1995_v27 = vmax.f32 %v1926_v56, 0.0 }
 0x2b3   :  { %1967 = vmatmul.bf16.gmra.mxu3 %v1827_v23  ;;  %v2023_v20 = vpack.c.bf16 %v1995_v27, %v1994_v32 }
 0x2b4   :  { %v1768_v2 = vpop.f32.mrf.mxu2 }
 0x2b5   :  { %2127 = vmatmul.bf16.gmra.mxu0 %v2023_v20  ;;  %v1769_v45 = vadd.f32 %v1768_v2, %v1680_v48 }
 0x2b6   :  { %v1681_v57 = vpop.f32.mrf.mxu1  ;;  %v1928_v62 = vpop.f32.mrf.mxu3 }
 0x2b7   :  { %v1682_v21 = vadd.f32 %v1681_v57, %v1593_v41  ;;  %v1929_v58 = vadd.f32 %v4348_v24, %v1928_v62  ;;  %v1809_v60 = vmax.f32 %v1769_v45, 0.0 }
 0x2b9   :  { %v1996_v8 = vmax.f32 %v1929_v58, 0.0 }
 0x2bc   :  { %v1770_v40 = vpop.f32.mrf.mxu2 }
 0x2bd   :  { %v1771_v30 = vadd.f32 %v1770_v40, %v1682_v21 }
 0x2be   :  { %v1684_v4 = vpop.f32.mrf.mxu1  ;;  %v1930_v35 = vpop.f32.mrf.mxu3 }
 0x2bf   :  { %v1810_v17 = vmax.f32 %v1771_v30, 0.0  ;;  %v1931_v12 = vadd.f32 %v4348_v24, %v1930_v35  ;;  %v1685_v18 = vadd.f32 %v1684_v4, %v1596_v33  ;;  %v4389_v35 = vld [vmem:[%s4539_s6] ss:$0 sm:$0xff] }
 0x2c1   :  { %v1828_v50 = vpack.c.bf16 %v1810_v17, %v1809_v60  ;;  %v1997_v39 = vmax.f32 %v1931_v12, 0.0 }
 0x2c3   :  { %v2024_v3 = vpack.c.bf16 %v1997_v39, %v1996_v8  ;;  %1972 = vmatmul.bf16.gmra.mxu3 %v1828_v50 }
 0x2c4   :  { %v1773_v44 = vpop.f32.mrf.mxu2 }
 0x2c5   :  { %2132 = vmatmul.bf16.gmra.mxu0 %v2024_v3  ;;  %v1774_v55 = vadd.f32 %v1773_v44, %v1685_v18 }
 0x2c6   :  { %v1686_v11 = vpop.f32.mrf.mxu1  ;;  %v1933_v63 = vpop.f32.mrf.mxu3 }
 0x2c7   :  { %v1687_v14 = vadd.f32 %v1686_v11, %v1598_v7  ;;  %v1934_v43 = vadd.f32 %v4348_v24, %v1933_v63  ;;  %v1811_v19 = vmax.f32 %v1774_v55, 0.0 }
 0x2c9   :  { %v1998_v29 = vmax.f32 %v1934_v43, 0.0 }
 0x2cc   :  { %v1775_v31 = vpop.f32.mrf.mxu2 }
 0x2cd   :  { %v1776_v52 = vadd.f32 %v1775_v31, %v1687_v14 }
 0x2ce   :  { %v1689_v53 = vpop.f32.mrf.mxu1  ;;  %v1935_v5 = vpop.f32.mrf.mxu3 }
 0x2cf   :  { %v1812_v6 = vmax.f32 %v1776_v52, 0.0  ;;  %v1936_v61 = vadd.f32 %v4348_v24, %v1935_v5  ;;  %v1690_v37 = vadd.f32 %v1689_v53, %v1601_v15 }
 0x2d1   :  { %v1829_v51 = vpack.c.bf16 %v1812_v6, %v1811_v19  ;;  %v1999_v38 = vmax.f32 %v1936_v61, 0.0 }
 0x2d3   :  { %v2025_v13 = vpack.c.bf16 %v1999_v38, %v1998_v29  ;;  %1977 = vmatmul.bf16.gmra.mxu3 %v1829_v51 }
 0x2d4   :  { %v1778_v26 = vpop.f32.mrf.mxu2 }
 0x2d5   :  { %2137 = vmatmul.bf16.gmra.mxu0 %v2025_v13  ;;  %v1779_v0 = vadd.f32 %v1778_v26, %v1690_v37 }
 0x2d6   :  { %v1938_v10 = vpop.f32.mrf.mxu3  ;;  %v1691_v34 = vpop.f32.mrf.mxu1 }
 0x2d7   :  { %v1692_v28 = vadd.f32 %v1691_v34, %v1603_v1  ;;  %v1939_v32 = vadd.f32 %v4348_v24, %v1938_v10  ;;  %v1813_v20 = vmax.f32 %v1779_v0, 0.0 }
 0x2d9   :  { %v2000_v22 = vmax.f32 %v1939_v32, 0.0 }
 0x2dc   :  { %v1780_v56 = vpop.f32.mrf.mxu2 }
 0x2dd   :  { %v1781_v23 = vadd.f32 %v1780_v56, %v1692_v28 }
 0x2de   :  { %v1940_v27 = vpop.f32.mrf.mxu3 }
 0x2df   :  { %v1814_v2 = vmax.f32 %v1781_v23, 0.0  ;;  %v1941_v36 = vadd.f32 %v4348_v24, %v1940_v27 }
 0x2e1   :  { %v1830_v42 = vpack.c.bf16 %v1814_v2, %v1813_v20  ;;  %v2001_v57 = vmax.f32 %v1941_v36, 0.0 }
 0x2e3   :  { %v2026_v62 = vpack.c.bf16 %v2001_v57, %v2000_v22  ;;  %1982 = vmatmul.bf16.gmra.mxu3 %v1830_v42 }
 0x2e5   :  { %2142 = vmatmul.bf16.gmra.mxu0 %v2026_v62 }
 0x2e6   :  { %v1943_v49 = vpop.f32.mrf.mxu3 }
 0x2e7   :  { %v1944_v9 = vadd.f32 %v4348_v24, %v1943_v49 }
 0x2e9   :  { %v2002_v48 = vmax.f32 %v1944_v9, 0.0 }
 0x2ee   :  { %v1945_v25 = vpop.f32.mrf.mxu3 }
 0x2ef   :  { %v1946_v41 = vadd.f32 %v4348_v24, %v1945_v25 }
 0x2f1   :  { %v2003_v45 = vmax.f32 %v1946_v41, 0.0 }
 0x2f3   :  { %v2027_v21 = vpack.c.bf16 %v2003_v45, %v2002_v48 }
 0x2f5   :  { %2147 = vmatmul.bf16.gmra.mxu0 %v2027_v21 }
 0x2f6   :  { %v1948_v40 = vpop.f32.mrf.mxu3 }
 0x2f7   :  { %v1949_v58 = vadd.f32 %v4348_v24, %v1948_v40 }
 0x2f9   :  { %v2004_v60 = vmax.f32 %v1949_v58, 0.0 }
 0x2fe   :  { %v1950_v30 = vpop.f32.mrf.mxu3 }
 0x2ff   :  { %v1951_v4 = vadd.f32 %v4348_v24, %v1950_v30 }
 0x301   :  { %v2005_v17 = vmax.f32 %v1951_v4, 0.0 }
 0x302   :  { %v2113_v12 = vpop.f32.mrf.mxu0 }
 0x303   :  { %v2028_v8 = vpack.c.bf16 %v2005_v17, %v2004_v60  ;;  %v2114_v50 = vadd.f32 %v4389_v35, %v2113_v12 }
 0x305   :  { %2193 = vst [vmem:[%s4540_s7] sm:$0xff] %v2114_v50  ;;  %2152 = vmatmul.bf16.gmra.mxu0 %v2028_v8 }
 0x306   :  { %v1953_v39 = vpop.f32.mrf.mxu3 }
 0x307   :  { %v1954_v44 = vadd.f32 %v4348_v24, %v1953_v39 }
 0x309   :  { %v2006_v63 = vmax.f32 %v1954_v44, 0.0 }
 0x30a   :  { %v2115_v59 = vpop.f32.mrf.mxu0 }
 0x30b   :  { %v2116_v3 = vadd.f32 %v4389_v35, %v2115_v59 }
 0x30d   :  { %2194 = vst [vmem:[%s4540_s7 + $0x8] sm:$0xff] %v2116_v3 }
 0x30e   :  { %v1955_v54 = vpop.f32.mrf.mxu3 }
 0x30f   :  { %v1956_v11 = vadd.f32 %v4348_v24, %v1955_v54 }
 0x311   :  { %v2007_v33 = vmax.f32 %v1956_v11, 0.0 }
 0x312   :  { %v2118_v7 = vpop.f32.mrf.mxu0 }
 0x313   :  { %v2029_v18 = vpack.c.bf16 %v2007_v33, %v2006_v63  ;;  %v2119_v55 = vadd.f32 %v4389_v35, %v2118_v7 }
 0x315   :  { %2195 = vst [vmem:[%s4540_s7 + $0x10] sm:$0xff] %v2119_v55  ;;  %2157 = vmatmul.bf16.gmra.mxu0 %v2029_v18 }
 0x316   :  { %v1958_v14 = vpop.f32.mrf.mxu3 }
 0x317   :  { %v1959_v43 = vadd.f32 %v4348_v24, %v1958_v14 }
 0x319   :  { %v2008_v5 = vmax.f32 %v1959_v43, 0.0 }
 0x31a   :  { %v2120_v47 = vpop.f32.mrf.mxu0 }
 0x31b   :  { %v2121_v31 = vadd.f32 %v4389_v35, %v2120_v47 }
 0x31d   :  { %2196 = vst [vmem:[%s4540_s7 + $0x18] sm:$0xff] %v2121_v31 }
 0x31e   :  { %v1960_v52 = vpop.f32.mrf.mxu3 }
 0x31f   :  { %v1961_v53 = vadd.f32 %v4348_v24, %v1960_v52 }
 0x321   :  { %v2009_v19 = vmax.f32 %v1961_v53, 0.0 }
 0x322   :  { %v2123_v6 = vpop.f32.mrf.mxu0 }
 0x323   :  { %v2030_v61 = vpack.c.bf16 %v2009_v19, %v2008_v5  ;;  %v2124_v29 = vadd.f32 %v4389_v35, %v2123_v6 }
 0x325   :  { %2197 = vst [vmem:[%s4540_s7 + $0x20] sm:$0xff] %v2124_v29  ;;  %2162 = vmatmul.bf16.gmra.mxu0 %v2030_v61 }
 0x326   :  { %v1963_v51 = vpop.f32.mrf.mxu3 }
 0x327   :  { %v1964_v26 = vadd.f32 %v4348_v24, %v1963_v51 }
 0x329   :  { %v2010_v10 = vmax.f32 %v1964_v26, 0.0 }
 0x32a   :  { %v2125_v38 = vpop.f32.mrf.mxu0 }
 0x32b   :  { %v2126_v13 = vadd.f32 %v4389_v35, %v2125_v38 }
 0x32d   :  { %2198 = vst [vmem:[%s4540_s7 + $0x28] sm:$0xff] %v2126_v13 }
 0x32e   :  { %v1965_v16 = vpop.f32.mrf.mxu3 }
 0x32f   :  { %v1966_v46 = vadd.f32 %v4348_v24, %v1965_v16 }
 0x331   :  { %v2011_v15 = vmax.f32 %v1966_v46, 0.0 }
 0x332   :  { %v2128_v34 = vpop.f32.mrf.mxu0 }
 0x333   :  { %v2031_v1 = vpack.c.bf16 %v2011_v15, %v2010_v10  ;;  %v2129_v37 = vadd.f32 %v4389_v35, %v2128_v34 }
 0x335   :  { %2199 = vst [vmem:[%s4540_s7 + $0x30] sm:$0xff] %v2129_v37  ;;  %2167 = vmatmul.bf16.gmra.mxu0 %v2031_v1 }
 0x336   :  { %v1968_v0 = vpop.f32.mrf.mxu3 }
 0x337   :  { %v1969_v32 = vadd.f32 %v4348_v24, %v1968_v0 }
 0x339   :  { %v2012_v20 = vmax.f32 %v1969_v32, 0.0 }
 0x33a   :  { %v2130_v28 = vpop.f32.mrf.mxu0 }
 0x33b   :  { %v2131_v56 = vadd.f32 %v4389_v35, %v2130_v28 }
 0x33d   :  { %2200 = vst [vmem:[%s4540_s7 + $0x38] sm:$0xff] %v2131_v56 }
 0x33e   :  { %v1970_v23 = vpop.f32.mrf.mxu3 }
 0x33f   :  { %v1971_v27 = vadd.f32 %v4348_v24, %v1970_v23 }
 0x341   :  { %v2013_v2 = vmax.f32 %v1971_v27, 0.0 }
 0x342   :  { %v2133_v36 = vpop.f32.mrf.mxu0 }
 0x343   :  { %v2032_v22 = vpack.c.bf16 %v2013_v2, %v2012_v20  ;;  %v2134_v42 = vadd.f32 %v4389_v35, %v2133_v36 }
 0x345   :  { %2201 = vst [vmem:[%s4540_s7 + $0x40] sm:$0xff] %v2134_v42  ;;  %2172 = vmatmul.bf16.gmra.mxu0 %v2032_v22 }
 0x346   :  { %v1973_v57 = vpop.f32.mrf.mxu3 }
 0x347   :  { %v1974_v9 = vadd.f32 %v4348_v24, %v1973_v57 }
 0x349   :  { %v2014_v48 = vmax.f32 %v1974_v9, 0.0 }
 0x34a   :  { %v2135_v62 = vpop.f32.mrf.mxu0 }
 0x34b   :  { %v2136_v49 = vadd.f32 %v4389_v35, %v2135_v62 }
 0x34d   :  { %2202 = vst [vmem:[%s4540_s7 + $0x48] sm:$0xff] %v2136_v49 }
 0x34e   :  { %v1975_v25 = vpop.f32.mrf.mxu3 }
 0x34f   :  { %v1976_v41 = vadd.f32 %v4348_v24, %v1975_v25 }
 0x351   :  { %v2015_v45 = vmax.f32 %v1976_v41, 0.0 }
 0x352   :  { %v2138_v21 = vpop.f32.mrf.mxu0 }
 0x353   :  { %v2033_v40 = vpack.c.bf16 %v2015_v45, %v2014_v48  ;;  %v2139_v58 = vadd.f32 %v4389_v35, %v2138_v21 }
 0x355   :  { %2203 = vst [vmem:[%s4540_s7 + $0x50] sm:$0xff] %v2139_v58  ;;  %2177 = vmatmul.bf16.gmra.mxu0 %v2033_v40 }
 0x356   :  { %v1978_v30 = vpop.f32.mrf.mxu3 }
 0x357   :  { %v1979_v17 = vadd.f32 %v4348_v24, %v1978_v30 }
 0x359   :  { %v2016_v50 = vmax.f32 %v1979_v17, 0.0 }
 0x35a   :  { %v2140_v4 = vpop.f32.mrf.mxu0 }
 0x35b   :  { %v2141_v60 = vadd.f32 %v4389_v35, %v2140_v4 }
 0x35d   :  { %2204 = vst [vmem:[%s4540_s7 + $0x58] sm:$0xff] %v2141_v60 }
 0x35e   :  { %v1980_v12 = vpop.f32.mrf.mxu3 }
 0x35f   :  { %v1981_v8 = vadd.f32 %v4348_v24, %v1980_v12 }
 0x361   :  { %v2017_v39 = vmax.f32 %v1981_v8, 0.0 }
 0x362   :  { %v2143_v59 = vpop.f32.mrf.mxu0 }
 0x363   :  { %v2034_v3 = vpack.c.bf16 %v2017_v39, %v2016_v50  ;;  %v2144_v44 = vadd.f32 %v4389_v35, %v2143_v59 }
 0x365   :  { %2205 = vst [vmem:[%s4540_s7 + $0x60] sm:$0xff] %v2144_v44  ;;  %2182 = vmatmul.bf16.gmra.mxu0 %v2034_v3 }
 0x366   :  { %v1983_v54 = vpop.f32.mrf.mxu3 }
 0x367   :  { %v1984_v33 = vadd.f32 %v4348_v24, %v1983_v54 }
 0x369   :  { %v2018_v55 = vmax.f32 %v1984_v33, 0.0 }
 0x36a   :  { %v2145_v11 = vpop.f32.mrf.mxu0 }
 0x36b   :  { %v2146_v63 = vadd.f32 %v4389_v35, %v2145_v11 }
 0x36d   :  { %2206 = vst [vmem:[%s4540_s7 + $0x68] sm:$0xff] %v2146_v63 }
 0x36e   :  { %v1985_v7 = vpop.f32.mrf.mxu3 }
 0x36f   :  { %v1986_v18 = vadd.f32 %v4348_v24, %v1985_v7 }
 0x371   :  { %v2019_v14 = vmax.f32 %v1986_v18, 0.0 }
 0x372   :  { %v2148_v47 = vpop.f32.mrf.mxu0 }
 0x373   :  { %v2035_v31 = vpack.c.bf16 %v2019_v14, %v2018_v55  ;;  %v2149_v43 = vadd.f32 %v4389_v35, %v2148_v47 }
 0x375   :  { %2207 = vst [vmem:[%s4540_s7 + $0x70] sm:$0xff] %v2149_v43  ;;  %2187 = vmatmul.bf16.gmra.mxu0 %v2035_v31 }
 0x37a   :  { %v2150_v52 = vpop.f32.mrf.mxu0 }
 0x37b   :  { %v2151_v53 = vadd.f32 %v4389_v35, %v2150_v52 }
 0x37d   :  { %2208 = vst [vmem:[%s4540_s7 + $0x78] sm:$0xff] %v2151_v53 }
 0x382   :  { %v2153_v5 = vpop.f32.mrf.mxu0 }
 0x383   :  { %v2154_v24 = vadd.f32 %v4389_v35, %v2153_v5 }
 0x385   :  { %2209 = vst [vmem:[%s4540_s7 + $0x80] sm:$0xff] %v2154_v24 }
 0x38a   :  { %v2155_v19 = vpop.f32.mrf.mxu0 }
 0x38b   :  { %v2156_v6 = vadd.f32 %v4389_v35, %v2155_v19 }
 0x38d   :  { %2210 = vst [vmem:[%s4540_s7 + $0x88] sm:$0xff] %v2156_v6 }
 0x392   :  { %v2158_v61 = vpop.f32.mrf.mxu0 }
 0x393   :  { %v2159_v29 = vadd.f32 %v4389_v35, %v2158_v61 }
 0x395   :  { %2211 = vst [vmem:[%s4540_s7 + $0x90] sm:$0xff] %v2159_v29 }
 0x39a   :  { %v2160_v51 = vpop.f32.mrf.mxu0 }
 0x39b   :  { %v2161_v38 = vadd.f32 %v4389_v35, %v2160_v51 }
 0x39d   :  { %2212 = vst [vmem:[%s4540_s7 + $0x98] sm:$0xff] %v2161_v38 }
 0x3a2   :  { %v2163_v13 = vpop.f32.mrf.mxu0 }
 0x3a3   :  { %v2164_v26 = vadd.f32 %v4389_v35, %v2163_v13 }
 0x3a5   :  { %2213 = vst [vmem:[%s4540_s7 + $0xa0] sm:$0xff] %v2164_v26 }
 0x3aa   :  { %v2165_v16 = vpop.f32.mrf.mxu0 }
 0x3ab   :  { %v2166_v46 = vadd.f32 %v4389_v35, %v2165_v16 }
 0x3ad   :  { %2214 = vst [vmem:[%s4540_s7 + $0xa8] sm:$0xff] %v2166_v46 }
 0x3b2   :  { %v2168_v10 = vpop.f32.mrf.mxu0 }
 0x3b3   :  { %v2169_v15 = vadd.f32 %v4389_v35, %v2168_v10 }
 0x3b5   :  { %2215 = vst [vmem:[%s4540_s7 + $0xb0] sm:$0xff] %v2169_v15 }
 0x3ba   :  { %v2170_v34 = vpop.f32.mrf.mxu0 }
 0x3bb   :  { %v2171_v1 = vadd.f32 %v4389_v35, %v2170_v34 }
 0x3bd   :  { %2216 = vst [vmem:[%s4540_s7 + $0xb8] sm:$0xff] %v2171_v1 }
 0x3c2   :  { %v2173_v37 = vpop.f32.mrf.mxu0 }
 0x3c3   :  { %v2174_v0 = vadd.f32 %v4389_v35, %v2173_v37 }
 0x3c5   :  { %2217 = vst [vmem:[%s4540_s7 + $0xc0] sm:$0xff] %v2174_v0 }
 0x3ca   :  { %v2175_v28 = vpop.f32.mrf.mxu0 }
 0x3cb   :  { %v2176_v56 = vadd.f32 %v4389_v35, %v2175_v28 }
 0x3cd   :  { %2218 = vst [vmem:[%s4540_s7 + $0xc8] sm:$0xff] %v2176_v56 }
 0x3d2   :  { %v2178_v32 = vpop.f32.mrf.mxu0 }
 0x3d3   :  { %v2179_v23 = vadd.f32 %v4389_v35, %v2178_v32 }
 0x3d5   :  { %2219 = vst [vmem:[%s4540_s7 + $0xd0] sm:$0xff] %v2179_v23 }
 0x3da   :  { %v2180_v27 = vpop.f32.mrf.mxu0 }
 0x3db   :  { %v2181_v20 = vadd.f32 %v4389_v35, %v2180_v27 }
 0x3dd   :  { %2220 = vst [vmem:[%s4540_s7 + $0xd8] sm:$0xff] %v2181_v20 }
 0x3e2   :  { %v2183_v2 = vpop.f32.mrf.mxu0 }
 0x3e3   :  { %v2184_v36 = vadd.f32 %v4389_v35, %v2183_v2 }
 0x3e5   :  { %2221 = vst [vmem:[%s4540_s7 + $0xe0] sm:$0xff] %v2184_v36 }
 0x3ea   :  { %v2185_v22 = vpop.f32.mrf.mxu0 }
 0x3eb   :  { %v2186_v42 = vadd.f32 %v4389_v35, %v2185_v22 }
 0x3ed   :  { %2222 = vst [vmem:[%s4540_s7 + $0xe8] sm:$0xff] %v2186_v42 }
 0x3f2   :  { %v2188_v57 = vpop.f32.mrf.mxu0 }
 0x3f3   :  { %v2189_v62 = vadd.f32 %v4389_v35, %v2188_v57 }
 0x3f5   :  { %2223 = vst [vmem:[%s4540_s7 + $0xf0] sm:$0xff] %v2189_v62 }
 0x3fa   :  { %v2190_v49 = vpop.f32.mrf.mxu0 }
 0x3fb   :  { %v2191_v9 = vadd.f32 %v4389_v35, %v2190_v49 }
 0x3fd   :  { %2224 = vst [vmem:[%s4540_s7 + $0xf8] sm:$0xff] %v2191_v9 }

</bundles_post_ra>
